<compile_context>
chip_gen: v5e
topology: v5e:2x2
jax: 0.10.0
libtpu: 0.0.40
codegen_flags: <defaults>
</compile_context>

<pallas_src>
import functools
import math

import numpy as np
import jax
import jax.numpy as jnp
from jax import lax
from jax.experimental import pallas as pl
from jax.experimental.pallas import tpu as pltpu


# --------------------------------------------------------------------------
# Parameter construction (deterministic, synthetic) — glue, plain JAX / numpy
# --------------------------------------------------------------------------

def kaiming_uniform(key, shape):
    fan_in = int(np.prod(shape[1:]))
    bound = math.sqrt(6.0 / fan_in)  # kaiming_uniform_ with a=0
    return jax.random.uniform(key, shape, jnp.float32, -bound, bound)


def make_orepa_params(key, in_ch, out_ch, k=3):
    """Parameters of one OREPA(in_ch, out_ch, kernel_size=3, groups=1, weight_only=True)."""
    keys = jax.random.split(key, 7)
    p = {}
    p["origin"] = kaiming_uniform(keys[0], (out_ch, in_ch, k, k))
    p["avg_conv"] = kaiming_uniform(keys[1], (out_ch, in_ch, 1, 1))
    p["pfir_conv"] = kaiming_uniform(keys[2], (out_ch, in_ch, 1, 1))
    p["avg_avg"] = jnp.full((k, k), 1.0 / (k * k), jnp.float32)
    p["w1x1"] = kaiming_uniform(keys[3], (out_ch, in_ch, 1, 1))
    # internal_channels_1x1_3x3 == in_channels (groups=1 <= 4)
    p["idconv1"] = jnp.zeros((in_ch, in_ch, 1, 1), jnp.float32)
    id_val = np.zeros((in_ch, in_ch, 1, 1), np.float32)
    for i in range(in_ch):
        id_val[i, i % in_ch, 0, 0] = 1.0
    p["id_tensor"] = jnp.asarray(id_val)
    p["conv2"] = kaiming_uniform(keys[4], (out_ch, in_ch, k, k))
    expand = 8
    p["gconv_dw"] = kaiming_uniform(keys[5], (in_ch * expand, 1, k, k))
    p["gconv_pw"] = kaiming_uniform(keys[6], (out_ch, in_ch * expand, 1, 1))
    # fre_init prior buffer
    prior = np.zeros((out_ch, k, k), np.float32)
    half_fg = out_ch / 2
    for i in range(out_ch):
        for h in range(3):
            for w in range(3):
                if i < half_fg:
                    prior[i, h, w] = math.cos(math.pi * (h + 0.5) * (i + 1) / 3)
                else:
                    prior[i, h, w] = math.cos(math.pi * (w + 0.5) * (i + 1 - half_fg) / 3)
    p["prior"] = jnp.asarray(prior)
    # vector (branch scales), init_hyper_gamma = 1.0
    vec = np.zeros((6, out_ch), np.float32)
    vec[0, :] = 0.25
    vec[1, :] = 0.25
    vec[2, :] = 0.0
    vec[3, :] = 0.5
    vec[4, :] = 1.0
    vec[5, :] = 0.5
    p["vector"] = jnp.asarray(vec)
    return p


def orepa_weight_gen(p):
    """OREPA.weight_gen (groups=1) in plain JAX. Returns (Cout, Cin, 3, 3)."""
    v = p["vector"]  # (6, Cout)

    def scale_o(w, row):  # einsum('oihw,o->oihw', w, vector[row])
        return w * v[row][:, None, None, None]

    w_origin = scale_o(p["origin"], 0)

    avg_conv = p["avg_conv"][:, :, 0, 0]  # (O, I)
    w_avg = scale_o(jnp.einsum("oi,hw->oihw", avg_conv, p["avg_avg"]), 1)

    pfir_conv = p["pfir_conv"][:, :, 0, 0]
    w_pfir = scale_o(jnp.einsum("oi,ohw->oihw", pfir_conv, p["prior"]), 2)

    conv1 = (p["idconv1"] + p["id_tensor"])[:, :, 0, 0]  # (t, i)
    w_1x1_kxk = scale_o(jnp.einsum("ti,othw->oihw", conv1, p["conv2"]), 3)

    w_1x1 = scale_o(jnp.pad(p["w1x1"], ((0, 0), (0, 0), (1, 1), (1, 1))), 4)

    # dwsc2full(dw, pw, groups=in_channels, groups_conv=1)
    dw = p["gconv_dw"]                      # (Cin*8, 1, 3, 3)
    pw = p["gconv_pw"][:, :, 0, 0]          # (Cout, Cin*8)
    cin = dw.shape[0] // 8
    cout = pw.shape[0]
    dw_r = dw.reshape(cin, 8, 1, 3, 3)      # (g, tg, ig, h, w)
    pw_r = pw.reshape(cout, cin, 8)         # (o, g, tg)
    w_gconv = jnp.einsum("gtihw,ogt->ogihw", dw_r, pw_r).reshape(cout, cin, 3, 3)
    w_gconv = scale_o(w_gconv, 5)

    return w_origin + w_avg + w_1x1 + w_1x1_kxk + w_pfir + w_gconv


def large_conv_weight_gen(orepa_params_list, groups=1):
    """OREPA_LargeConv.weight_gen: compose 3x3 OREPA weights into a KxK weight."""
    assert groups == 1
    w = jnp.transpose(orepa_weight_gen(orepa_params_list[0]), (1, 0, 2, 3))  # (Cin, C, 3, 3)
    for p in orepa_params_list[1:]:
        w2 = orepa_weight_gen(p)  # (C', C, 3, 3)
        w = lax.conv_general_dilated(
            w, w2, window_strides=(1, 1), padding=[(2, 2), (2, 2)],
            dimension_numbers=("NCHW", "OIHW", "NCHW"),
            precision=lax.Precision.HIGHEST)
    return jnp.transpose(w, (1, 0, 2, 3))  # (Cout, Cin, K, K)


# --------------------------------------------------------------------------
# Pallas kernel: per-tap accumulated MXU matmuls over a resident VMEM input
# slab, fused with the BN(eval) bias and SiLU epilogue.
# --------------------------------------------------------------------------

def _conv_bn_silu_kernel(x_ref, w_ref, b_ref, o_ref, *, K, Wp, THW, win_len):
    # x_ref: (1, Cin, L_in)    bf16 zero-padded stride-1 input, flattened with
    #                          row stride Wp; resident in VMEM per batch elem.
    # w_ref: (K*K, Cout, Cin)  bf16 per-tap weights with BN scale folded in.
    # b_ref: (Cout, 1)         f32 fused BN bias.
    # o_ref: (1, Cout, THW)    f32 lane-dense output tile (unmasked stores).
    t = pl.program_id(1)
    base = pl.multiple_of(t * THW, 128)            # 128-aligned dynamic start
    win = x_ref[0, :, pl.ds(base, win_len)]        # (Cin, THW + halo) window
    cout = w_ref.shape[1]
    acc = jnp.zeros((cout, THW), jnp.float32)
    for kh in range(K):                            # unrolled K*K per-tap MXU
        for kw in range(K):                        # matmuls, f32 accumulation
            off = kh * Wp + kw                     # static lane offset
            xs = win[:, off:off + THW]             # (Cin, THW) shifted view
            acc = acc + jnp.dot(w_ref[kh * K + kw], xs,
                                preferred_element_type=jnp.float32)
    y = acc + b_ref[...]                           # BatchNorm (eval) bias
    o_ref[0] = (y * jax.nn.sigmoid(y)).astype(o_ref.dtype)   # SiLU, f32 epilogue


def orepa_large_conv_forward(x_nchw, weight_oikk, bn_scale, bn_bias, stride, padding):
    """Fused conv + BatchNorm(eval) + SiLU.  x: (N, Cin, H, W) -> (N, Cout, Ho, Wo)."""
    N, Cin, H, W = x_nchw.shape
    Cout, _, K, _ = weight_oikk.shape
    Hp, Wp = H + 2 * padding, W + 2 * padding
    Ho1, Wo1 = Hp - K + 1, Wp - K + 1              # stride-1 output extent

    # Stride-1 output, flattened with row stride Wp (columns [Wo1, Wp) are junk
    # and are sliced off after the kernel).
    L_out = Ho1 * Wp
    THW = min(1024, pl.cdiv(L_out, 128) * 128)     # spatial (lane) tile
    n_tiles = pl.cdiv(L_out, THW)
    L_out_p = n_tiles * THW
    halo = (K - 1) * Wp + (K - 1)
    win_len = pl.cdiv(THW + halo, 128) * 128       # per-tile input window (static)
    L_in = (n_tiles - 1) * THW + win_len           # padded flat input length

    # ---- layout plumbing (cheap XLA glue, single pass over the input) ----
    x_pad = jnp.pad(x_nchw, ((0, 0), (0, 0), (padding, padding), (padding, padding)))
    x_flat = x_pad.reshape(N, Cin, Hp * Wp)
    x_flat = jnp.pad(x_flat, ((0, 0), (0, 0), (0, L_in - Hp * Wp))).astype(jnp.bfloat16)

    # Fold the eval-mode BN scale into the weight; reorder to per-tap layout.
    w_fused = weight_oikk.astype(jnp.float32) * bn_scale.reshape(-1, 1, 1, 1)
    w_taps = jnp.transpose(w_fused, (2, 3, 0, 1)).reshape(K * K, Cout, Cin)
    w_taps = w_taps.astype(jnp.bfloat16)
    bias = bn_bias.astype(jnp.float32).reshape(Cout, 1)

    kernel = functools.partial(_conv_bn_silu_kernel,
                               K=K, Wp=Wp, THW=THW, win_len=win_len)

    # VMEM footprint: double-buffered input + output blocks, resident weight/bias.
    # Sized explicitly so the same choice is safe on v7x's 64 MiB physical VMEM.
    vmem_need = (2 * Cin * L_in * 2 + 2 * Cout * THW * 4
                 + K * K * Cout * Cin * 2 + Cout * 4)
    vmem_limit = int(min(48 * 2**20, max(16 * 2**20, 2 * vmem_need)))

    cost = pl.CostEstimate(
        flops=2 * N * Cout * Cin * K * K * L_out_p,
        transcendentals=N * Cout * L_out_p,
        bytes_accessed=int(x_flat.size * 2 + w_taps.size * 2 + bias.size * 4
                           + N * Cout * L_out_p * 4))

    # NOTE: for large Cout (>=128) an additional Cout grid axis with a 128/256
    # row block would keep the weight slice + accumulator small; not needed at
    # these channel counts.
    out = pl.pallas_call(
        kernel,
        out_shape=jax.ShapeDtypeStruct((N, Cout, L_out_p), jnp.float32),
        grid=(N, n_tiles),
        in_specs=[
            pl.BlockSpec((1, Cin, L_in), lambda n, t: (n, 0, 0)),     # resident per batch
            pl.BlockSpec((K * K, Cout, Cin), lambda n, t: (0, 0, 0)),  # resident weight
            pl.BlockSpec((Cout, 1), lambda n, t: (0, 0)),              # resident bias
        ],
        out_specs=pl.BlockSpec((1, Cout, THW), lambda n, t: (n, 0, t)),
        compiler_params=pltpu.CompilerParams(
            dimension_semantics=("parallel", "parallel"),
            vmem_limit_bytes=vmem_limit),
        cost_estimate=cost,
    )(x_flat, w_taps, bias)

    # Drop lane padding and junk columns; subsample for strided convs (exact).
    out = out[:, :, :L_out].reshape(N, Cout, Ho1, Wp)[:, :, :, :Wo1]
    if stride > 1:
        out = out[:, :, ::stride, ::stride]
    return out


# --------------------------------------------------------------------------
# Pure-JAX references for verification
# --------------------------------------------------------------------------

def reference_forward(x_nchw, weight_oikk, bn_scale, bn_bias, stride, padding):
    out = lax.conv_general_dilated(
        x_nchw, weight_oikk, (stride, stride),
        [(padding, padding), (padding, padding)],
        dimension_numbers=("NCHW", "OIHW", "NCHW"),
        precision=lax.Precision.HIGHEST)
    y = out * bn_scale.reshape(1, -1, 1, 1) + bn_bias.reshape(1, -1, 1, 1)
    return y * jax.nn.sigmoid(y)


def reference_forward_bf16(x_nchw, weight_oikk, bn_scale, bn_bias, stride, padding):
    """Same math as the kernel (bf16-rounded operands, f32 accumulation)."""
    w_fused = (weight_oikk.astype(jnp.float32) * bn_scale.reshape(-1, 1, 1, 1))
    w_fused = w_fused.astype(jnp.bfloat16).astype(jnp.float32)
    x_b = x_nchw.astype(jnp.bfloat16).astype(jnp.float32)
    out = lax.conv_general_dilated(
        x_b, w_fused, (stride, stride),
        [(padding, padding), (padding, padding)],
        dimension_numbers=("NCHW", "OIHW", "NCHW"),
        precision=lax.Precision.HIGHEST)
    y = out + bn_bias.reshape(1, -1, 1, 1)
    return y * jax.nn.sigmoid(y)


# --------------------------------------------------------------------------

if __name__ == "__main__":
    # OREPA_LargeConv(in_channels=4, out_channels=8, kernel_size=5, stride=1)
    N, Cin, H, W = 2, 4, 16, 16
    Cout, K, stride = 8, 5, 1
    padding = K // 2               # autopad(5, None, 1) = 2
    layers = (K - 1) // 2          # 2

    key = jax.random.PRNGKey(0)
    k_x, k0, k1 = jax.random.split(key, 3)
    x = jax.random.normal(k_x, (N, Cin, H, W), jnp.float32)

    # OREPA sub-modules: weight0: (Cin -> Cout, 3x3), weight1: (Cout -> Cout, 3x3)
    orepa_params = [make_orepa_params(k0, Cin, Cout),
                    make_orepa_params(k1, Cout, Cout)]
    weight = large_conv_weight_gen(orepa_params)   # (Cout, Cin, 5, 5)

    # BatchNorm2d(out_channels), eval-mode running stats (default init)
    # TODO(synk): training-mode BN (per-batch statistics) not implemented; eval-mode used.
    gamma = jnp.ones((Cout,), jnp.float32)
    beta = jnp.zeros((Cout,), jnp.float32)
    rmean = jnp.zeros((Cout,), jnp.float32)
    rvar = jnp.ones((Cout,), jnp.float32)
    eps = 1e-5
    bn_scale = gamma / jnp.sqrt(rvar + eps)
    bn_bias = beta - rmean * bn_scale

    out = orepa_large_conv_forward(x, weight, bn_scale, bn_bias, stride, padding)
    out = jax.block_until_ready(out)
    assert out.shape == (N, Cout, H, W), out.shape

    # Tight check: same math as the kernel (bf16 operands, f32 accumulation).
    ref_bf16 = reference_forward_bf16(x, weight, bn_scale, bn_bias, stride, padding)
    np.testing.assert_allclose(np.asarray(out), np.asarray(ref_bf16),
                               rtol=2e-3, atol=2e-3)
    # Loose semantic check vs full-f32 module math (difference is bf16 rounding).
    ref_f32 = reference_forward(x, weight, bn_scale, bn_bias, stride, padding)
    np.testing.assert_allclose(np.asarray(out), np.asarray(ref_f32),
                               rtol=1e-1, atol=1e-1)
    print("KERNEL_OK")
</pallas_src>

<mosaic_0001>
module attributes {stable_mosaic.version = 11 : i64} {
  func.func @_conv_bn_silu_kernel(%arg0: i32, %arg1: i32, %arg2: memref<1x4x512xbf16, #tpu.memory_space<vmem>>, %arg3: memref<25x8x4xbf16, #tpu.memory_space<vmem>>, %arg4: memref<8x1xf32, #tpu.memory_space<vmem>>, %arg5: memref<1x8x384xf32, #tpu.memory_space<vmem>>) attributes {dimension_semantics = [#tpu.dimension_semantics<parallel>, #tpu.dimension_semantics<parallel>], iteration_bounds = array<i64: 2, 1>, scalar_prefetch = 0 : i64, scratch_operands = 0 : i64, tpu.core_type = #tpu.core_type<tc>, window_params = [{transform_indices = @transform_0, window_bounds = array<i64: 1, 4, 512>}, {pipeline_mode = #tpu.pipeline_mode<synchronous>, transform_indices = @transform_1, window_bounds = array<i64: 25, 8, 4>}, {pipeline_mode = #tpu.pipeline_mode<synchronous>, transform_indices = @transform_2, window_bounds = array<i64: 8, 1>}, {transform_indices = @transform_3, window_bounds = array<i64: 1, 8, 384>}]} {
    %c384_i32 = arith.constant 384 : i32
    %0 = arith.muli %arg1, %c384_i32 : i32
    %1 = tpu.assume_multiple %0, 128 : i32
    %c0 = arith.constant 0 : index
    %c0_0 = arith.constant 0 : index
    %2 = arith.index_cast %1 : i32 to index
    %3 = vector.load %arg2[%c0, %c0_0, %2] : memref<1x4x512xbf16, #tpu.memory_space<vmem>>, vector<1x4x512xbf16>
    %4 = vector.shape_cast %3 : vector<1x4x512xbf16> to vector<4x512xbf16>
    %cst = arith.constant 0.000000e+00 : f32
    %5 = vector.broadcast %cst : f32 to vector<8x384xf32>
    %6 = vector.extract_strided_slice %4 {offsets = [0, 0], sizes = [4, 384], strides = [1, 1]} : vector<4x512xbf16> to vector<4x384xbf16>
    %c0_1 = arith.constant 0 : index
    %c0_2 = arith.constant 0 : index
    %c0_3 = arith.constant 0 : index
    %7 = vector.load %arg3[%c0_1, %c0_2, %c0_3] : memref<25x8x4xbf16, #tpu.memory_space<vmem>>, vector<1x8x4xbf16>
    %8 = vector.shape_cast %7 : vector<1x8x4xbf16> to vector<8x4xbf16>
    %cst_4 = arith.constant dense<0.000000e+00> : vector<8x384xf32>
    %9 = tpu.matmul %8, %6, %cst_4 {dimension_numbers = #tpu.dot_dimension_numbers<[1], [0], [0], [1], [0, 0, 1, 1], [], []>} : vector<8x4xbf16>, vector<4x384xbf16>, vector<8x384xf32> -> vector<8x384xf32>
    %10 = arith.addf %5, %9 : vector<8x384xf32>
    %11 = vector.extract_strided_slice %4 {offsets = [0, 1], sizes = [4, 384], strides = [1, 1]} : vector<4x512xbf16> to vector<4x384xbf16>
    %c1 = arith.constant 1 : index
    %c0_5 = arith.constant 0 : index
    %c0_6 = arith.constant 0 : index
    %12 = vector.load %arg3[%c1, %c0_5, %c0_6] : memref<25x8x4xbf16, #tpu.memory_space<vmem>>, vector<1x8x4xbf16>
    %13 = vector.shape_cast %12 : vector<1x8x4xbf16> to vector<8x4xbf16>
    %cst_7 = arith.constant dense<0.000000e+00> : vector<8x384xf32>
    %14 = tpu.matmul %13, %11, %cst_7 {dimension_numbers = #tpu.dot_dimension_numbers<[1], [0], [0], [1], [0, 0, 1, 1], [], []>} : vector<8x4xbf16>, vector<4x384xbf16>, vector<8x384xf32> -> vector<8x384xf32>
    %15 = arith.addf %10, %14 : vector<8x384xf32>
    %16 = vector.extract_strided_slice %4 {offsets = [0, 2], sizes = [4, 384], strides = [1, 1]} : vector<4x512xbf16> to vector<4x384xbf16>
    %c2 = arith.constant 2 : index
    %c0_8 = arith.constant 0 : index
    %c0_9 = arith.constant 0 : index
    %17 = vector.load %arg3[%c2, %c0_8, %c0_9] : memref<25x8x4xbf16, #tpu.memory_space<vmem>>, vector<1x8x4xbf16>
    %18 = vector.shape_cast %17 : vector<1x8x4xbf16> to vector<8x4xbf16>
    %cst_10 = arith.constant dense<0.000000e+00> : vector<8x384xf32>
    %19 = tpu.matmul %18, %16, %cst_10 {dimension_numbers = #tpu.dot_dimension_numbers<[1], [0], [0], [1], [0, 0, 1, 1], [], []>} : vector<8x4xbf16>, vector<4x384xbf16>, vector<8x384xf32> -> vector<8x384xf32>
    %20 = arith.addf %15, %19 : vector<8x384xf32>
    %21 = vector.extract_strided_slice %4 {offsets = [0, 3], sizes = [4, 384], strides = [1, 1]} : vector<4x512xbf16> to vector<4x384xbf16>
    %c3 = arith.constant 3 : index
    %c0_11 = arith.constant 0 : index
    %c0_12 = arith.constant 0 : index
    %22 = vector.load %arg3[%c3, %c0_11, %c0_12] : memref<25x8x4xbf16, #tpu.memory_space<vmem>>, vector<1x8x4xbf16>
    %23 = vector.shape_cast %22 : vector<1x8x4xbf16> to vector<8x4xbf16>
    %cst_13 = arith.constant dense<0.000000e+00> : vector<8x384xf32>
    %24 = tpu.matmul %23, %21, %cst_13 {dimension_numbers = #tpu.dot_dimension_numbers<[1], [0], [0], [1], [0, 0, 1, 1], [], []>} : vector<8x4xbf16>, vector<4x384xbf16>, vector<8x384xf32> -> vector<8x384xf32>
    %25 = arith.addf %20, %24 : vector<8x384xf32>
    %26 = vector.extract_strided_slice %4 {offsets = [0, 4], sizes = [4, 384], strides = [1, 1]} : vector<4x512xbf16> to vector<4x384xbf16>
    %c4 = arith.constant 4 : index
    %c0_14 = arith.constant 0 : index
    %c0_15 = arith.constant 0 : index
    %27 = vector.load %arg3[%c4, %c0_14, %c0_15] : memref<25x8x4xbf16, #tpu.memory_space<vmem>>, vector<1x8x4xbf16>
    %28 = vector.shape_cast %27 : vector<1x8x4xbf16> to vector<8x4xbf16>
    %cst_16 = arith.constant dense<0.000000e+00> : vector<8x384xf32>
    %29 = tpu.matmul %28, %26, %cst_16 {dimension_numbers = #tpu.dot_dimension_numbers<[1], [0], [0], [1], [0, 0, 1, 1], [], []>} : vector<8x4xbf16>, vector<4x384xbf16>, vector<8x384xf32> -> vector<8x384xf32>
    %30 = arith.addf %25, %29 : vector<8x384xf32>
    %31 = vector.extract_strided_slice %4 {offsets = [0, 20], sizes = [4, 384], strides = [1, 1]} : vector<4x512xbf16> to vector<4x384xbf16>
    %c5 = arith.constant 5 : index
    %c0_17 = arith.constant 0 : index
    %c0_18 = arith.constant 0 : index
    %32 = vector.load %arg3[%c5, %c0_17, %c0_18] : memref<25x8x4xbf16, #tpu.memory_space<vmem>>, vector<1x8x4xbf16>
    %33 = vector.shape_cast %32 : vector<1x8x4xbf16> to vector<8x4xbf16>
    %cst_19 = arith.constant dense<0.000000e+00> : vector<8x384xf32>
    %34 = tpu.matmul %33, %31, %cst_19 {dimension_numbers = #tpu.dot_dimension_numbers<[1], [0], [0], [1], [0, 0, 1, 1], [], []>} : vector<8x4xbf16>, vector<4x384xbf16>, vector<8x384xf32> -> vector<8x384xf32>
    %35 = arith.addf %30, %34 : vector<8x384xf32>
    %36 = vector.extract_strided_slice %4 {offsets = [0, 21], sizes = [4, 384], strides = [1, 1]} : vector<4x512xbf16> to vector<4x384xbf16>
    %c6 = arith.constant 6 : index
    %c0_20 = arith.constant 0 : index
    %c0_21 = arith.constant 0 : index
    %37 = vector.load %arg3[%c6, %c0_20, %c0_21] : memref<25x8x4xbf16, #tpu.memory_space<vmem>>, vector<1x8x4xbf16>
    %38 = vector.shape_cast %37 : vector<1x8x4xbf16> to vector<8x4xbf16>
    %cst_22 = arith.constant dense<0.000000e+00> : vector<8x384xf32>
    %39 = tpu.matmul %38, %36, %cst_22 {dimension_numbers = #tpu.dot_dimension_numbers<[1], [0], [0], [1], [0, 0, 1, 1], [], []>} : vector<8x4xbf16>, vector<4x384xbf16>, vector<8x384xf32> -> vector<8x384xf32>
    %40 = arith.addf %35, %39 : vector<8x384xf32>
    %41 = vector.extract_strided_slice %4 {offsets = [0, 22], sizes = [4, 384], strides = [1, 1]} : vector<4x512xbf16> to vector<4x384xbf16>
    %c7 = arith.constant 7 : index
    %c0_23 = arith.constant 0 : index
    %c0_24 = arith.constant 0 : index
    %42 = vector.load %arg3[%c7, %c0_23, %c0_24] : memref<25x8x4xbf16, #tpu.memory_space<vmem>>, vector<1x8x4xbf16>
    %43 = vector.shape_cast %42 : vector<1x8x4xbf16> to vector<8x4xbf16>
    %cst_25 = arith.constant dense<0.000000e+00> : vector<8x384xf32>
    %44 = tpu.matmul %43, %41, %cst_25 {dimension_numbers = #tpu.dot_dimension_numbers<[1], [0], [0], [1], [0, 0, 1, 1], [], []>} : vector<8x4xbf16>, vector<4x384xbf16>, vector<8x384xf32> -> vector<8x384xf32>
    %45 = arith.addf %40, %44 : vector<8x384xf32>
    %46 = vector.extract_strided_slice %4 {offsets = [0, 23], sizes = [4, 384], strides = [1, 1]} : vector<4x512xbf16> to vector<4x384xbf16>
    %c8 = arith.constant 8 : index
    %c0_26 = arith.constant 0 : index
    %c0_27 = arith.constant 0 : index
    %47 = vector.load %arg3[%c8, %c0_26, %c0_27] : memref<25x8x4xbf16, #tpu.memory_space<vmem>>, vector<1x8x4xbf16>
    %48 = vector.shape_cast %47 : vector<1x8x4xbf16> to vector<8x4xbf16>
    %cst_28 = arith.constant dense<0.000000e+00> : vector<8x384xf32>
    %49 = tpu.matmul %48, %46, %cst_28 {dimension_numbers = #tpu.dot_dimension_numbers<[1], [0], [0], [1], [0, 0, 1, 1], [], []>} : vector<8x4xbf16>, vector<4x384xbf16>, vector<8x384xf32> -> vector<8x384xf32>
    %50 = arith.addf %45, %49 : vector<8x384xf32>
    %51 = vector.extract_strided_slice %4 {offsets = [0, 24], sizes = [4, 384], strides = [1, 1]} : vector<4x512xbf16> to vector<4x384xbf16>
    %c9 = arith.constant 9 : index
    %c0_29 = arith.constant 0 : index
    %c0_30 = arith.constant 0 : index
    %52 = vector.load %arg3[%c9, %c0_29, %c0_30] : memref<25x8x4xbf16, #tpu.memory_space<vmem>>, vector<1x8x4xbf16>
    %53 = vector.shape_cast %52 : vector<1x8x4xbf16> to vector<8x4xbf16>
    %cst_31 = arith.constant dense<0.000000e+00> : vector<8x384xf32>
    %54 = tpu.matmul %53, %51, %cst_31 {dimension_numbers = #tpu.dot_dimension_numbers<[1], [0], [0], [1], [0, 0, 1, 1], [], []>} : vector<8x4xbf16>, vector<4x384xbf16>, vector<8x384xf32> -> vector<8x384xf32>
    %55 = arith.addf %50, %54 : vector<8x384xf32>
    %56 = vector.extract_strided_slice %4 {offsets = [0, 40], sizes = [4, 384], strides = [1, 1]} : vector<4x512xbf16> to vector<4x384xbf16>
    %c10 = arith.constant 10 : index
    %c0_32 = arith.constant 0 : index
    %c0_33 = arith.constant 0 : index
    %57 = vector.load %arg3[%c10, %c0_32, %c0_33] : memref<25x8x4xbf16, #tpu.memory_space<vmem>>, vector<1x8x4xbf16>
    %58 = vector.shape_cast %57 : vector<1x8x4xbf16> to vector<8x4xbf16>
    %cst_34 = arith.constant dense<0.000000e+00> : vector<8x384xf32>
    %59 = tpu.matmul %58, %56, %cst_34 {dimension_numbers = #tpu.dot_dimension_numbers<[1], [0], [0], [1], [0, 0, 1, 1], [], []>} : vector<8x4xbf16>, vector<4x384xbf16>, vector<8x384xf32> -> vector<8x384xf32>
    %60 = arith.addf %55, %59 : vector<8x384xf32>
    %61 = vector.extract_strided_slice %4 {offsets = [0, 41], sizes = [4, 384], strides = [1, 1]} : vector<4x512xbf16> to vector<4x384xbf16>
    %c11 = arith.constant 11 : index
    %c0_35 = arith.constant 0 : index
    %c0_36 = arith.constant 0 : index
    %62 = vector.load %arg3[%c11, %c0_35, %c0_36] : memref<25x8x4xbf16, #tpu.memory_space<vmem>>, vector<1x8x4xbf16>
    %63 = vector.shape_cast %62 : vector<1x8x4xbf16> to vector<8x4xbf16>
    %cst_37 = arith.constant dense<0.000000e+00> : vector<8x384xf32>
    %64 = tpu.matmul %63, %61, %cst_37 {dimension_numbers = #tpu.dot_dimension_numbers<[1], [0], [0], [1], [0, 0, 1, 1], [], []>} : vector<8x4xbf16>, vector<4x384xbf16>, vector<8x384xf32> -> vector<8x384xf32>
    %65 = arith.addf %60, %64 : vector<8x384xf32>
    %66 = vector.extract_strided_slice %4 {offsets = [0, 42], sizes = [4, 384], strides = [1, 1]} : vector<4x512xbf16> to vector<4x384xbf16>
    %c12 = arith.constant 12 : index
    %c0_38 = arith.constant 0 : index
    %c0_39 = arith.constant 0 : index
    %67 = vector.load %arg3[%c12, %c0_38, %c0_39] : memref<25x8x4xbf16, #tpu.memory_space<vmem>>, vector<1x8x4xbf16>
    %68 = vector.shape_cast %67 : vector<1x8x4xbf16> to vector<8x4xbf16>
    %cst_40 = arith.constant dense<0.000000e+00> : vector<8x384xf32>
    %69 = tpu.matmul %68, %66, %cst_40 {dimension_numbers = #tpu.dot_dimension_numbers<[1], [0], [0], [1], [0, 0, 1, 1], [], []>} : vector<8x4xbf16>, vector<4x384xbf16>, vector<8x384xf32> -> vector<8x384xf32>
    %70 = arith.addf %65, %69 : vector<8x384xf32>
    %71 = vector.extract_strided_slice %4 {offsets = [0, 43], sizes = [4, 384], strides = [1, 1]} : vector<4x512xbf16> to vector<4x384xbf16>
    %c13 = arith.constant 13 : index
    %c0_41 = arith.constant 0 : index
    %c0_42 = arith.constant 0 : index
    %72 = vector.load %arg3[%c13, %c0_41, %c0_42] : memref<25x8x4xbf16, #tpu.memory_space<vmem>>, vector<1x8x4xbf16>
    %73 = vector.shape_cast %72 : vector<1x8x4xbf16> to vector<8x4xbf16>
    %cst_43 = arith.constant dense<0.000000e+00> : vector<8x384xf32>
    %74 = tpu.matmul %73, %71, %cst_43 {dimension_numbers = #tpu.dot_dimension_numbers<[1], [0], [0], [1], [0, 0, 1, 1], [], []>} : vector<8x4xbf16>, vector<4x384xbf16>, vector<8x384xf32> -> vector<8x384xf32>
    %75 = arith.addf %70, %74 : vector<8x384xf32>
    %76 = vector.extract_strided_slice %4 {offsets = [0, 44], sizes = [4, 384], strides = [1, 1]} : vector<4x512xbf16> to vector<4x384xbf16>
    %c14 = arith.constant 14 : index
    %c0_44 = arith.constant 0 : index
    %c0_45 = arith.constant 0 : index
    %77 = vector.load %arg3[%c14, %c0_44, %c0_45] : memref<25x8x4xbf16, #tpu.memory_space<vmem>>, vector<1x8x4xbf16>
    %78 = vector.shape_cast %77 : vector<1x8x4xbf16> to vector<8x4xbf16>
    %cst_46 = arith.constant dense<0.000000e+00> : vector<8x384xf32>
    %79 = tpu.matmul %78, %76, %cst_46 {dimension_numbers = #tpu.dot_dimension_numbers<[1], [0], [0], [1], [0, 0, 1, 1], [], []>} : vector<8x4xbf16>, vector<4x384xbf16>, vector<8x384xf32> -> vector<8x384xf32>
    %80 = arith.addf %75, %79 : vector<8x384xf32>
    %81 = vector.extract_strided_slice %4 {offsets = [0, 60], sizes = [4, 384], strides = [1, 1]} : vector<4x512xbf16> to vector<4x384xbf16>
    %c15 = arith.constant 15 : index
    %c0_47 = arith.constant 0 : index
    %c0_48 = arith.constant 0 : index
    %82 = vector.load %arg3[%c15, %c0_47, %c0_48] : memref<25x8x4xbf16, #tpu.memory_space<vmem>>, vector<1x8x4xbf16>
    %83 = vector.shape_cast %82 : vector<1x8x4xbf16> to vector<8x4xbf16>
    %cst_49 = arith.constant dense<0.000000e+00> : vector<8x384xf32>
    %84 = tpu.matmul %83, %81, %cst_49 {dimension_numbers = #tpu.dot_dimension_numbers<[1], [0], [0], [1], [0, 0, 1, 1], [], []>} : vector<8x4xbf16>, vector<4x384xbf16>, vector<8x384xf32> -> vector<8x384xf32>
    %85 = arith.addf %80, %84 : vector<8x384xf32>
    %86 = vector.extract_strided_slice %4 {offsets = [0, 61], sizes = [4, 384], strides = [1, 1]} : vector<4x512xbf16> to vector<4x384xbf16>
    %c16 = arith.constant 16 : index
    %c0_50 = arith.constant 0 : index
    %c0_51 = arith.constant 0 : index
    %87 = vector.load %arg3[%c16, %c0_50, %c0_51] : memref<25x8x4xbf16, #tpu.memory_space<vmem>>, vector<1x8x4xbf16>
    %88 = vector.shape_cast %87 : vector<1x8x4xbf16> to vector<8x4xbf16>
    %cst_52 = arith.constant dense<0.000000e+00> : vector<8x384xf32>
    %89 = tpu.matmul %88, %86, %cst_52 {dimension_numbers = #tpu.dot_dimension_numbers<[1], [0], [0], [1], [0, 0, 1, 1], [], []>} : vector<8x4xbf16>, vector<4x384xbf16>, vector<8x384xf32> -> vector<8x384xf32>
    %90 = arith.addf %85, %89 : vector<8x384xf32>
    %91 = vector.extract_strided_slice %4 {offsets = [0, 62], sizes = [4, 384], strides = [1, 1]} : vector<4x512xbf16> to vector<4x384xbf16>
    %c17 = arith.constant 17 : index
    %c0_53 = arith.constant 0 : index
    %c0_54 = arith.constant 0 : index
    %92 = vector.load %arg3[%c17, %c0_53, %c0_54] : memref<25x8x4xbf16, #tpu.memory_space<vmem>>, vector<1x8x4xbf16>
    %93 = vector.shape_cast %92 : vector<1x8x4xbf16> to vector<8x4xbf16>
    %cst_55 = arith.constant dense<0.000000e+00> : vector<8x384xf32>
    %94 = tpu.matmul %93, %91, %cst_55 {dimension_numbers = #tpu.dot_dimension_numbers<[1], [0], [0], [1], [0, 0, 1, 1], [], []>} : vector<8x4xbf16>, vector<4x384xbf16>, vector<8x384xf32> -> vector<8x384xf32>
    %95 = arith.addf %90, %94 : vector<8x384xf32>
    %96 = vector.extract_strided_slice %4 {offsets = [0, 63], sizes = [4, 384], strides = [1, 1]} : vector<4x512xbf16> to vector<4x384xbf16>
    %c18 = arith.constant 18 : index
    %c0_56 = arith.constant 0 : index
    %c0_57 = arith.constant 0 : index
    %97 = vector.load %arg3[%c18, %c0_56, %c0_57] : memref<25x8x4xbf16, #tpu.memory_space<vmem>>, vector<1x8x4xbf16>
    %98 = vector.shape_cast %97 : vector<1x8x4xbf16> to vector<8x4xbf16>
    %cst_58 = arith.constant dense<0.000000e+00> : vector<8x384xf32>
    %99 = tpu.matmul %98, %96, %cst_58 {dimension_numbers = #tpu.dot_dimension_numbers<[1], [0], [0], [1], [0, 0, 1, 1], [], []>} : vector<8x4xbf16>, vector<4x384xbf16>, vector<8x384xf32> -> vector<8x384xf32>
    %100 = arith.addf %95, %99 : vector<8x384xf32>
    %101 = vector.extract_strided_slice %4 {offsets = [0, 64], sizes = [4, 384], strides = [1, 1]} : vector<4x512xbf16> to vector<4x384xbf16>
    %c19 = arith.constant 19 : index
    %c0_59 = arith.constant 0 : index
    %c0_60 = arith.constant 0 : index
    %102 = vector.load %arg3[%c19, %c0_59, %c0_60] : memref<25x8x4xbf16, #tpu.memory_space<vmem>>, vector<1x8x4xbf16>
    %103 = vector.shape_cast %102 : vector<1x8x4xbf16> to vector<8x4xbf16>
    %cst_61 = arith.constant dense<0.000000e+00> : vector<8x384xf32>
    %104 = tpu.matmul %103, %101, %cst_61 {dimension_numbers = #tpu.dot_dimension_numbers<[1], [0], [0], [1], [0, 0, 1, 1], [], []>} : vector<8x4xbf16>, vector<4x384xbf16>, vector<8x384xf32> -> vector<8x384xf32>
    %105 = arith.addf %100, %104 : vector<8x384xf32>
    %106 = vector.extract_strided_slice %4 {offsets = [0, 80], sizes = [4, 384], strides = [1, 1]} : vector<4x512xbf16> to vector<4x384xbf16>
    %c20 = arith.constant 20 : index
    %c0_62 = arith.constant 0 : index
    %c0_63 = arith.constant 0 : index
    %107 = vector.load %arg3[%c20, %c0_62, %c0_63] : memref<25x8x4xbf16, #tpu.memory_space<vmem>>, vector<1x8x4xbf16>
    %108 = vector.shape_cast %107 : vector<1x8x4xbf16> to vector<8x4xbf16>
    %cst_64 = arith.constant dense<0.000000e+00> : vector<8x384xf32>
    %109 = tpu.matmul %108, %106, %cst_64 {dimension_numbers = #tpu.dot_dimension_numbers<[1], [0], [0], [1], [0, 0, 1, 1], [], []>} : vector<8x4xbf16>, vector<4x384xbf16>, vector<8x384xf32> -> vector<8x384xf32>
    %110 = arith.addf %105, %109 : vector<8x384xf32>
    %111 = vector.extract_strided_slice %4 {offsets = [0, 81], sizes = [4, 384], strides = [1, 1]} : vector<4x512xbf16> to vector<4x384xbf16>
    %c21 = arith.constant 21 : index
    %c0_65 = arith.constant 0 : index
    %c0_66 = arith.constant 0 : index
    %112 = vector.load %arg3[%c21, %c0_65, %c0_66] : memref<25x8x4xbf16, #tpu.memory_space<vmem>>, vector<1x8x4xbf16>
    %113 = vector.shape_cast %112 : vector<1x8x4xbf16> to vector<8x4xbf16>
    %cst_67 = arith.constant dense<0.000000e+00> : vector<8x384xf32>
    %114 = tpu.matmul %113, %111, %cst_67 {dimension_numbers = #tpu.dot_dimension_numbers<[1], [0], [0], [1], [0, 0, 1, 1], [], []>} : vector<8x4xbf16>, vector<4x384xbf16>, vector<8x384xf32> -> vector<8x384xf32>
    %115 = arith.addf %110, %114 : vector<8x384xf32>
    %116 = vector.extract_strided_slice %4 {offsets = [0, 82], sizes = [4, 384], strides = [1, 1]} : vector<4x512xbf16> to vector<4x384xbf16>
    %c22 = arith.constant 22 : index
    %c0_68 = arith.constant 0 : index
    %c0_69 = arith.constant 0 : index
    %117 = vector.load %arg3[%c22, %c0_68, %c0_69] : memref<25x8x4xbf16, #tpu.memory_space<vmem>>, vector<1x8x4xbf16>
    %118 = vector.shape_cast %117 : vector<1x8x4xbf16> to vector<8x4xbf16>
    %cst_70 = arith.constant dense<0.000000e+00> : vector<8x384xf32>
    %119 = tpu.matmul %118, %116, %cst_70 {dimension_numbers = #tpu.dot_dimension_numbers<[1], [0], [0], [1], [0, 0, 1, 1], [], []>} : vector<8x4xbf16>, vector<4x384xbf16>, vector<8x384xf32> -> vector<8x384xf32>
    %120 = arith.addf %115, %119 : vector<8x384xf32>
    %121 = vector.extract_strided_slice %4 {offsets = [0, 83], sizes = [4, 384], strides = [1, 1]} : vector<4x512xbf16> to vector<4x384xbf16>
    %c23 = arith.constant 23 : index
    %c0_71 = arith.constant 0 : index
    %c0_72 = arith.constant 0 : index
    %122 = vector.load %arg3[%c23, %c0_71, %c0_72] : memref<25x8x4xbf16, #tpu.memory_space<vmem>>, vector<1x8x4xbf16>
    %123 = vector.shape_cast %122 : vector<1x8x4xbf16> to vector<8x4xbf16>
    %cst_73 = arith.constant dense<0.000000e+00> : vector<8x384xf32>
    %124 = tpu.matmul %123, %121, %cst_73 {dimension_numbers = #tpu.dot_dimension_numbers<[1], [0], [0], [1], [0, 0, 1, 1], [], []>} : vector<8x4xbf16>, vector<4x384xbf16>, vector<8x384xf32> -> vector<8x384xf32>
    %125 = arith.addf %120, %124 : vector<8x384xf32>
    %126 = vector.extract_strided_slice %4 {offsets = [0, 84], sizes = [4, 384], strides = [1, 1]} : vector<4x512xbf16> to vector<4x384xbf16>
    %c24 = arith.constant 24 : index
    %c0_74 = arith.constant 0 : index
    %c0_75 = arith.constant 0 : index
    %127 = vector.load %arg3[%c24, %c0_74, %c0_75] : memref<25x8x4xbf16, #tpu.memory_space<vmem>>, vector<1x8x4xbf16>
    %128 = vector.shape_cast %127 : vector<1x8x4xbf16> to vector<8x4xbf16>
    %cst_76 = arith.constant dense<0.000000e+00> : vector<8x384xf32>
    %129 = tpu.matmul %128, %126, %cst_76 {dimension_numbers = #tpu.dot_dimension_numbers<[1], [0], [0], [1], [0, 0, 1, 1], [], []>} : vector<8x4xbf16>, vector<4x384xbf16>, vector<8x384xf32> -> vector<8x384xf32>
    %130 = arith.addf %125, %129 : vector<8x384xf32>
    %c0_77 = arith.constant 0 : index
    %c0_78 = arith.constant 0 : index
    %131 = vector.load %arg4[%c0_77, %c0_78] : memref<8x1xf32, #tpu.memory_space<vmem>>, vector<8x1xf32>
    %132 = vector.broadcast %131 : vector<8x1xf32> to vector<8x384xf32>
    %133 = arith.addf %130, %132 : vector<8x384xf32>
    %134 = arith.negf %133 : vector<8x384xf32>
    %135 = math.exp %134 : vector<8x384xf32>
    %cst_79 = arith.constant 1.000000e+00 : f32
    %136 = vector.broadcast %cst_79 : f32 to vector<8x384xf32>
    %137 = arith.addf %136, %135 : vector<8x384xf32>
    %138 = arith.divf %136, %137 : vector<8x384xf32>
    %139 = arith.mulf %133, %138 : vector<8x384xf32>
    %c0_80 = arith.constant 0 : index
    %c0_81 = arith.constant 0 : index
    %c0_82 = arith.constant 0 : index
    %140 = vector.load %arg5[%c0_80, %c0_81, %c0_82] : memref<1x8x384xf32, #tpu.memory_space<vmem>>, vector<1x8x384xf32>
    %141 = vector.shape_cast %140 : vector<1x8x384xf32> to vector<8x384xf32>
    %142 = vector.shape_cast %139 : vector<8x384xf32> to vector<1x8x384xf32>
    tpu.vector_store %arg5[%c0_80, %c0_81, %c0_82], %142 {strides = array<i32>} : memref<1x8x384xf32, #tpu.memory_space<vmem>>, vector<1x8x384xf32>,
    return
  }
  func.func @transform_0(%arg0: i32, %arg1: i32) -> (i32, i32, i32) {
    %c0_i32 = arith.constant 0 : i32
    %c0_i32_0 = arith.constant 0 : i32
    %c0_i32_1 = arith.constant 0 : i32
    return %arg0, %c0_i32, %c0_i32_0 : i32, i32, i32
  }
  func.func @transform_1(%arg0: i32, %arg1: i32) -> (i32, i32, i32) {
    %c0_i32 = arith.constant 0 : i32
    %c0_i32_0 = arith.constant 0 : i32
    %c0_i32_1 = arith.constant 0 : i32
    %c0_i32_2 = arith.constant 0 : i32
    return %c0_i32, %c0_i32_0, %c0_i32_1 : i32, i32, i32
  }
  func.func @transform_2(%arg0: i32, %arg1: i32) -> (i32, i32) {
    %c0_i32 = arith.constant 0 : i32
    %c0_i32_0 = arith.constant 0 : i32
    %c0_i32_1 = arith.constant 0 : i32
    return %c0_i32, %c0_i32_0 : i32, i32
  }
  func.func @transform_3(%arg0: i32, %arg1: i32) -> (i32, i32, i32) {
    %c0_i32 = arith.constant 0 : i32
    %c0_i32_0 = arith.constant 0 : i32
    return %arg0, %c0_i32, %arg1 : i32, i32, i32
  }
}

</mosaic_0001>

<bundles_post_ra>
// kernel: tpu_custom_call.1
= control target key start
LH: loop header
LB: loop body
LE: loop exit
PB: predicated region body
PF: predicated region fallthrough
CT: control target
= control target key end

     0   :  { %8 = vsyncpa [#allocation3], 0  ;;  %s3134_s0 = inlined_call_operand.vmem [shape: bf16[2,4,512], index: 0, kind: input, shape index: {}]   ;;  %s3135_s1 = inlined_call_operand.vmem [shape: bf16[25,8,4], index: 1, kind: input, shape index: {}]   ;;  %s3136_s2 = inlined_call_operand.vmem [shape: f32[8,1], index: 2, kind: input, shape index: {}]   ;;  %s3137_s3 = inlined_call_operand.hbm [shape: f32[2,8,384], index: 3, kind: output, shape index: {}]  }
   0x1   :  { %10 = vsyncpa [#allocation3 + $0x1], 0  ;;  %s2588_s12 = smov 0   ;;  %s2590_s13 = smov 0  }
   0x2   :  { %s2592_s14 = smov 0   ;;  %s2594_s15 = smov 0  }
   0x3   :  { %s2596_s16 = smov 0   ;;  %s2598_s17 = smov 0  }
   0x4 LB: > { %s2255_s18 = sadd.s32 4294967295, %s2541_s17   ;;  %s2256_s19 = sadd.s32 4294967294, %s2541_s17   ;;  %s2541_s17 = sphi %s2598_s17, %s16_s17   ;;  %s2537_s16 = sphi %s2596_s16, %s3144_s16   ;;  %s2533_s15 = sphi %s2594_s15, %s3143_s15   ;;  %s2529_s14 = sphi %s2592_s14, %s3142_s14   ;;  %s2525_s13 = sphi %s2590_s13, %s3141_s13   ;;  %s2521_s12 = sphi %s2588_s12, %s3140_s12  }
   0x5   : > { %s28_s20 = sadd.s32 1, %s2537_s16  ;;  %s105_s21 = sadd.s32 1, %s2529_s14 }
   0x6   : > { %p30_p0 = scmp.ge.s32.totalorder %s28_s20, 2  ;;  %p115_p1 = scmp.ne.s32.totalorder %s2529_s14, %s2525_s13 }
   0x7   : > { %p116_p2 = scmp.eq.s32.totalorder %s2255_s18, 1  ;;  %p121_p3 = scmp.ne.s32.totalorder %s2525_s13, %s2521_s12 }
   0x8   : > { %s3146_s20 = smov (%p30_p0, %s28_s20), 0  ;;  %p122_p5 = scmp.eq.s32.totalorder %s2256_s19, 1 }
   0x9   : > { %p2628_p4 = por %p116_p2, %p115_p1  ;;  %s100_s23 = ssub.s32 %s2537_s16, %s3146_s20 }
   0xa   : > { %p2259_p6 = scmp.ge.s32.totalorder %s2541_s17, 1  ;;  %p103_p7 = scmp.eq.s32.totalorder %s100_s23, 0 }
   0xb   : > { %p2635_p8 = por %p122_p5, %p121_p3  ;;  %p154_p9 = scmp.lt.s32.totalorder %s2541_s17, 3 }
   0xc   : > { %s2641_s25 = scalar_select %p103_p7, %s2529_s14, %s105_s21  }
   0xd   : > { %p155_p10 = pnand %p2259_p6, %p154_p9 }
   0xe   : > { %p178_p11 = scmp.lt.s32.totalorder (!%p155_p10), %s2533_s15, 1  ;;  %s2543_s4 = smov (!%p155_p10), 127  }
   0xf   : > { %158 = sbr.rel (%p155_p10) target bundleno = 619 (0x26b), region = 32  ;;  %s2544_s5 = smov (!%p155_p10), 126  }
  0x10   : > { %s2545_s6 = smov (!%p155_p10), 125   ;;  %s2546_s7 = smov (!%p155_p10), 124  }
  0x11   : > { %s2547_s8 = smov (!%p155_p10), 108   ;;  %s2548_s9 = smov (!%p155_p10), 107  }
  0x12   : > { %s2549_s10 = smov (!%p155_p10), 106   ;;  %s2550_s11 = smov (!%p155_p10), 105  }
  0x13   : > { %s2551_s21 = smov (!%p155_p10), 104   ;;  %s2552_s23 = smov (!%p155_p10), 88  }
  0x14   : > { %s179_s26 = scalar_select %p178_p11, %s2533_s15, 1  ;;  %vm220_vm0 = vcmask 1041408   ;;  %v2673_v45 = vld [vmem:[%s3135_s1] sm:$0xf]  ;;  %vm216_vm1 = vcmask 31744   ;;  %vm340_vm2 = vcmask 1031168  }
  0x15   : > { %vm212_vm3 = vcmask 1039360   ;;  %s2554_s29 = smov 86   ;;  %vm417_vm4 = vcmask 1022976   ;;  %vm494_vm5 = vcmask 1014784   ;;  %vm571_vm6 = vcmask 883712   ;;  %s175_s18 = sand.u32 1, %s2525_s13  }
  0x16   : > { %s2367_s27 = sshll.u32 %s179_s26, 3  ;;  %s2553_s26 = smov 87   ;;  %vm648_vm7 = vcmask 875520   ;;  %vm725_vm8 = vcmask 867328   ;;  %vm802_vm9 = vcmask 859136   ;;  %vm956_vm10 = vcmask 719872  }
  0x17   : > { %s182_s30 = scalar_lea.vmem %s3134_s0, %s2367_s27  ;;  %vm879_vm11 = vcmask 850944   ;;  %vm1033_vm12 = vcmask 711680   ;;  %vm1110_vm13 = vcmask 703488   ;;  %vm1187_vm14 = vcmask 695296   ;;  %s2566_s27 = smov 44  }
  0x18   : > { %v2648_v0 = vld [vmem:[%s182_s30] sm:$0xff]  ;;  %s2555_s30 = smov 85   ;;  %vm1264_vm15 = vcmask 687104   ;;  %s2368_s19 = smul.u32 24, %s175_s18 }
  0x19   : > { %195 = vst [vmem:[#allocation1] ss:$4 sm:$0xff] %v2648_v0 }
  0x20   : > { %v200_v1 = vld.sshfl [vmem:[#allocation1 + $0x10] sm:$0xff pattern:$0x73625140]  ;;  %v196_v2 = vld.sshfl [vmem:[#allocation1] sm:$0xff pattern:$0x73625140] }
  0x21   : > { %208 = vrot.lane.b32.xlu0 %v200_v1, %s2543_s4  ;;  %204 = vrot.lane.b32.xlu1 %v196_v2, %s2543_s4  ;;  %v202_v3 = vld.sshfl [vmem:[#allocation1 + $0x18] sm:$0xff pattern:$0x73625140]  ;;  %v198_v4 = vld.sshfl [vmem:[#allocation1 + $0x8] sm:$0xff pattern:$0x73625140] }
  0x22   : > { %269 = vst [vmem:[#allocation1] ss:$4 sm:$0xff] %v2648_v0 }
  0x29   : > { %210 = vrot.lane.b32.xlu0 %v202_v3, %s2543_s4  ;;  %206 = vrot.lane.b32.xlu1 %v198_v4, %s2543_s4  ;;  %v2652_v5 = vld.sshfl [vmem:[#allocation1] sm:$0xff pattern:$0x73625140]  ;;  %v2654_v6 = vld.sshfl [vmem:[#allocation1 + $0x8] sm:$0xff pattern:$0x73625140] }
  0x2a   : > { %v2656_v7 = vld.sshfl [vmem:[#allocation1 + $0x10] sm:$0xff pattern:$0x73625140]  ;;  %v276_v40 = vsel %vm220_vm0, %v2652_v5, 0  ;;  %v278_v5 = vsel %vm220_vm0, %v2654_v6, 0 }
  0x2b   : > { %323 = vst [vmem:[#allocation1] ss:$4 sm:$0xff] %v2648_v0  ;;  %289 = vmatpush.bf16.msra.mxu3 %v276_v40  ;;  %v280_v6 = vsel %vm220_vm0, %v2656_v7, 0  ;;  %v2273_v40 = vld [vmem:[%s3135_s1 + $0xc] sm:$0xf] }
  0x2e   : > { %2266 = vmatmul.msk.bf16.vlgmr.msra.gmra.mxu3 %vm216_vm1, %v2673_v45 }
  0x32   : > { %v328_v8 = vld.sshfl [vmem:[#allocation1 + $0x10] sm:$0xff pattern:$0x73625140]  ;;  %v330_v9 = vld.sshfl [vmem:[#allocation1 + $0x18] sm:$0xff pattern:$0x73625140] }
  0x33   : > { %336 = vrot.lane.b32.xlu0 %v328_v8, %s2544_s5  ;;  %v326_v10 = vld.sshfl [vmem:[#allocation1 + $0x8] sm:$0xff pattern:$0x73625140]  ;;  %v324_v11 = vld.sshfl [vmem:[#allocation1] sm:$0xff pattern:$0x73625140] }
  0x34   : > { %332 = vrot.lane.b32.xlu2 %v324_v11, %s2544_s5  ;;  %400 = vst [vmem:[#allocation1] ss:$4 sm:$0xff] %v2648_v0 }
  0x3b   : > { %v403_v12 = vld.sshfl [vmem:[#allocation1 + $0x8] sm:$0xff pattern:$0x73625140]  ;;  %v405_v13 = vld.sshfl [vmem:[#allocation1 + $0x10] sm:$0xff pattern:$0x73625140]  ;;  %338 = vrot.lane.b32.xlu0 %v330_v9, %s2544_s5 }
  0x3c   : > { %v407_v14 = vld.sshfl [vmem:[#allocation1 + $0x18] sm:$0xff pattern:$0x73625140]  ;;  %411 = vrot.lane.b32.xlu1 %v403_v12, %s2545_s6  ;;  %334 = vrot.lane.b32.xlu2 %v326_v10, %s2544_s5  ;;  %v401_v15 = vld.sshfl [vmem:[#allocation1] sm:$0xff pattern:$0x73625140] }
  0x3d   : > { %477 = vst [vmem:[#allocation1] ss:$4 sm:$0xff] %v2648_v0  ;;  %v2262_v12 = vld [vmem:[%s3135_s1 + $0x4] sm:$0xf]  ;;  %s2562_s5 = smov 48  }
  0x44   : > { %409 = vrot.lane.b32.xlu1 %v401_v15, %s2545_s6  ;;  %v482_v16 = vld.sshfl [vmem:[#allocation1 + $0x10] sm:$0xff pattern:$0x73625140]  ;;  %v478_v17 = vld.sshfl [vmem:[#allocation1] sm:$0xff pattern:$0x73625140]  ;;  %413 = vrot.lane.b32.xlu2 %v405_v13, %s2545_s6 }
  0x45   : > { %490 = vrot.lane.b32.xlu0 %v482_v16, %s2546_s7  ;;  %v484_v18 = vld.sshfl [vmem:[#allocation1 + $0x18] sm:$0xff pattern:$0x73625140]  ;;  %v480_v19 = vld.sshfl [vmem:[#allocation1 + $0x8] sm:$0xff pattern:$0x73625140] }
  0x46   : > { %554 = vst [vmem:[#allocation1] ss:$4 sm:$0xff] %v2648_v0 }
  0x4c   : > { %492 = vrot.lane.b32.xlu1 %v484_v18, %s2546_s7  ;;  %415 = vrot.lane.b32.xlu2 %v407_v14, %s2545_s6  ;;  %s2556_s6 = smov 84  }
  0x4d   : > { %488 = vrot.lane.b32.xlu0 %v480_v19, %s2546_s7  ;;  %v555_v20 = vld.sshfl [vmem:[#allocation1] sm:$0xff pattern:$0x73625140]  ;;  %v557_v21 = vld.sshfl [vmem:[#allocation1 + $0x8] sm:$0xff pattern:$0x73625140] }
  0x4e   : > { %v559_v22 = vld.sshfl [vmem:[#allocation1 + $0x10] sm:$0xff pattern:$0x73625140]  ;;  %v561_v23 = vld.sshfl [vmem:[#allocation1 + $0x18] sm:$0xff pattern:$0x73625140] }
  0x4f   : > { %631 = vst [vmem:[#allocation1] ss:$4 sm:$0xff] %v2648_v0 }
  0x54   : > { %563 = vrot.lane.b32.xlu1 %v555_v20, %s2547_s8  ;;  %486 = vrot.lane.b32.xlu2 %v478_v17, %s2546_s7 }
  0x56   : > { %v632_v24 = vld.sshfl [vmem:[#allocation1] sm:$0xff pattern:$0x73625140]  ;;  %v638_v25 = vld.sshfl [vmem:[#allocation1 + $0x18] sm:$0xff pattern:$0x73625140] }
  0x57   : > { %640 = vrot.lane.b32.xlu0 %v632_v24, %s2548_s9  ;;  %v634_v26 = vld.sshfl [vmem:[#allocation1 + $0x8] sm:$0xff pattern:$0x73625140]  ;;  %v636_v27 = vld.sshfl [vmem:[#allocation1 + $0x10] sm:$0xff pattern:$0x73625140] }
  0x58   : > { %708 = vst [vmem:[#allocation1] ss:$4 sm:$0xff] %v2648_v0 }
  0x5c   : > { %642 = vrot.lane.b32.xlu1 %v634_v26, %s2548_s9  ;;  %565 = vrot.lane.b32.xlu2 %v557_v21, %s2547_s8 }
  0x5f   : > { %569 = vrot.lane.b32.xlu0 %v561_v23, %s2547_s8  ;;  %v713_v28 = vld.sshfl [vmem:[#allocation1 + $0x10] sm:$0xff pattern:$0x73625140]  ;;  %v709_v29 = vld.sshfl [vmem:[#allocation1] sm:$0xff pattern:$0x73625140] }
  0x60   : > { %v711_v30 = vld.sshfl [vmem:[#allocation1 + $0x8] sm:$0xff pattern:$0x73625140]  ;;  %v715_v31 = vld.sshfl [vmem:[#allocation1 + $0x18] sm:$0xff pattern:$0x73625140] }
  0x61   : > { %785 = vst [vmem:[#allocation1] ss:$4 sm:$0xff] %v2648_v0 }
  0x64   : > { %644 = vrot.lane.b32.xlu1 %v636_v27, %s2548_s9  ;;  %567 = vrot.lane.b32.xlu2 %v559_v22, %s2547_s8  ;;  %v2269_v22 = vld [vmem:[%s3135_s1 + $0x8] sm:$0xf]  ;;  %s2483_s8 = scalar_lea.hbm %s3137_s3, 48 }
  0x67   : > { %721 = vrot.lane.b32.xlu0 %v713_v28, %s2549_s10 }
  0x68   : > { %v790_v32 = vld.sshfl [vmem:[#allocation1 + $0x10] sm:$0xff pattern:$0x73625140]  ;;  %v792_v33 = vld.sshfl [vmem:[#allocation1 + $0x18] sm:$0xff pattern:$0x73625140] }
  0x69   : > { %v788_v34 = vld.sshfl [vmem:[#allocation1 + $0x8] sm:$0xff pattern:$0x73625140]  ;;  %v786_v35 = vld.sshfl [vmem:[#allocation1] sm:$0xff pattern:$0x73625140] }
  0x6a   : > { %862 = vst [vmem:[#allocation1] ss:$4 sm:$0xff] %v2648_v0 }
  0x6c   : > { %646 = vrot.lane.b32.xlu1 %v638_v25, %s2548_s9  ;;  %719 = vrot.lane.b32.xlu2 %v711_v30, %s2549_s10  ;;  %s2557_s9 = smov 68  }
  0x6f   : > { %723 = vrot.lane.b32.xlu0 %v715_v31, %s2549_s10 }
  0x71   : > { %v865_v36 = vld.sshfl [vmem:[#allocation1 + $0x8] sm:$0xff pattern:$0x73625140]  ;;  %v867_v37 = vld.sshfl [vmem:[#allocation1 + $0x10] sm:$0xff pattern:$0x73625140] }
  0x72   : > { %v869_v38 = vld.sshfl [vmem:[#allocation1 + $0x18] sm:$0xff pattern:$0x73625140]  ;;  %v863_v39 = vld.sshfl [vmem:[#allocation1] sm:$0xff pattern:$0x73625140] }
  0x73   : > { %939 = vst [vmem:[#allocation1] ss:$4 sm:$0xff] %v2648_v0 }
  0x74   : > { %798 = vrot.lane.b32.xlu1 %v790_v32, %s2550_s11  ;;  %717 = vrot.lane.b32.xlu2 %v709_v29, %s2549_s10  ;;  %s2558_s10 = smov 67  }
  0x77   : > { %794 = vrot.lane.b32.xlu0 %v786_v35, %s2550_s11 }
  0x7a   : > { %v940_v41 = vld.sshfl [vmem:[#allocation1] sm:$0xff pattern:$0x73625140]  ;;  %v942_v42 = vld.sshfl [vmem:[#allocation1 + $0x8] sm:$0xff pattern:$0x73625140] }
  0x7b   : > { %v944_v43 = vld.sshfl [vmem:[#allocation1 + $0x10] sm:$0xff pattern:$0x73625140]  ;;  %v946_v44 = vld.sshfl [vmem:[#allocation1 + $0x18] sm:$0xff pattern:$0x73625140] }
  0x7c   : > { %796 = vrot.lane.b32.xlu1 %v788_v34, %s2550_s11  ;;  %1016 = vst [vmem:[#allocation1] ss:$4 sm:$0xff] %v2648_v0  ;;  %800 = vrot.lane.b32.xlu2 %v792_v33, %s2550_s11  ;;  %s2564_s11 = smov 46  }
  0x7f   : > { %873 = vrot.lane.b32.xlu0 %v865_v36, %s2551_s21 }
  0x83   : > { %v1019_v46 = vld.sshfl [vmem:[#allocation1 + $0x8] sm:$0xff pattern:$0x73625140]  ;;  %v1021_v47 = vld.sshfl [vmem:[#allocation1 + $0x10] sm:$0xff pattern:$0x73625140] }
  0x84   : > { %948 = vrot.lane.b32.xlu1 %v940_v41, %s2552_s23  ;;  %871 = vrot.lane.b32.xlu2 %v863_v39, %s2551_s21  ;;  %v1017_v48 = vld.sshfl [vmem:[#allocation1] sm:$0xff pattern:$0x73625140]  ;;  %v1023_v49 = vld.sshfl [vmem:[#allocation1 + $0x18] sm:$0xff pattern:$0x73625140] }
  0x85   : > { %1093 = vst [vmem:[#allocation1] ss:$4 sm:$0xff] %v2648_v0 }
  0x87   : > { %875 = vrot.lane.b32.xlu0 %v867_v37, %s2551_s21 }
  0x8c   : > { %877 = vrot.lane.b32.xlu1 %v869_v38, %s2551_s21  ;;  %950 = vrot.lane.b32.xlu2 %v942_v42, %s2552_s23  ;;  %v1100_v50 = vld.sshfl [vmem:[#allocation1 + $0x18] sm:$0xff pattern:$0x73625140]  ;;  %v2680_v51 = vld.sshfl [vmem:[#allocation1 + $0x8] sm:$0xff pattern:$0x73625140] }
  0x8d   : > { %v1098_v52 = vld.sshfl [vmem:[#allocation1 + $0x10] sm:$0xff pattern:$0x73625140]  ;;  %v1094_v53 = vld.sshfl [vmem:[#allocation1] sm:$0xff pattern:$0x73625140] }
  0x8e   : > { %v333_v54 = vpop.permute.xlu2 %332  ;;  %1170 = vst [vmem:[#allocation1] ss:$4 sm:$0xff] %v2648_v0  ;;  %s2565_s21 = smov 45  }
  0x8f   : > { %1027 = vrot.lane.b32.xlu0 %v1019_v46, %s2553_s26 }
  0x93   : > { %v209_v55 = vpop.permute.xlu0 %208  ;;  %v205_v56 = vpop.permute.xlu1 %204 }
  0x94   : > { %1029 = vrot.lane.b32.xlu1 %v1021_v47, %s2553_s26  ;;  %952 = vrot.lane.b32.xlu2 %v944_v43, %s2552_s23 }
  0x95   : > { %v1171_v57 = vld.sshfl [vmem:[#allocation1] sm:$0xff pattern:$0x73625140]  ;;  %v2684_v58 = vld.sshfl [vmem:[#allocation1 + $0x10] sm:$0xff pattern:$0x73625140] }
  0x96   : > { %v335_v59 = vpop.permute.xlu2 %334  ;;  %v2686_v60 = vld.sshfl [vmem:[#allocation1 + $0x18] sm:$0xff pattern:$0x73625140]  ;;  %v1173_v61 = vld.sshfl [vmem:[#allocation1 + $0x8] sm:$0xff pattern:$0x73625140] }
  0x97   : > { %1025 = vrot.lane.b32.xlu0 %v1017_v48, %s2553_s26  ;;  %1247 = vst [vmem:[#allocation1] ss:$4 sm:$0xff] %v2648_v0  ;;  %v341_v62 = vsel %vm340_vm2, %v333_v54, %v335_v59 }
  0x98   : > { %v348_v11 = vsel %vm220_vm0, %v341_v62, 0 }
  0x9b   : > { %v211_v63 = vpop.permute.xlu0 %210  ;;  %v207_v1 = vpop.permute.xlu1 %206 }
  0x9c   : > { %1031 = vrot.lane.b32.xlu1 %v1023_v49, %s2553_s26  ;;  %v213_v2 = vsel %vm212_vm3, %v205_v56, %v207_v1  ;;  %v214_v3 = vsel %vm212_vm3, %v207_v1, %v209_v55  ;;  %v215_v4 = vsel %vm212_vm3, %v209_v55, %v211_v63  ;;  %954 = vrot.lane.b32.xlu2 %v946_v44, %s2552_s23  ;;  %s2559_s23 = smov 66   ;;  %s2560_s26 = smov 65   ;;  %vm1418_vm3 = vcmask 547840  }
  0x9d   : > { %v222_v8 = vsel %vm220_vm0, %v213_v2, 0  ;;  %v225_v9 = vsel %vm220_vm0, %v214_v3, 0  ;;  %v228_v10 = vsel %vm220_vm0, %v215_v4, 0  ;;  %v2281_v2 = vld [vmem:[%s3135_s1 + $0x14] sm:$0xf] }
  0x9e   : > { %237 = vmatpush.bf16.msra.mxu0 %v222_v8  ;;  %250 = vmatpush.bf16.msra.mxu1 %v225_v9  ;;  %v414_v13 = vpop.permute.xlu2 %413  ;;  %v2703_v14 = vld.sshfl [vmem:[#allocation1 + $0x18] sm:$0xff pattern:$0x73625140]  ;;  %v1248_v15 = vld.sshfl [vmem:[#allocation1] sm:$0xff pattern:$0x73625140] }
  0x9f   : > { %263 = vmatpush.bf16.msra.mxu2 %v228_v10  ;;  %1108 = vrot.lane.b32.xlu0 %v1100_v50, %s2554_s29  ;;  %v1250_v16 = vld.sshfl [vmem:[#allocation1 + $0x8] sm:$0xff pattern:$0x73625140]  ;;  %v1252_v17 = vld.sshfl [vmem:[#allocation1 + $0x10] sm:$0xff pattern:$0x73625140] }
  0xa0   : > { %1324 = vst [vmem:[#allocation1] ss:$4 sm:$0xff] %v2648_v0  ;;  %v2277_v4 = vld [vmem:[%s3135_s1 + $0x10] sm:$0xf] }
  0xa1   : > { %2263 = vmatmul.msk.bf16.vlgmr.msra.gmra.mxu0 %vm216_vm1, %v2262_v12  ;;  %2264 = vmatmul.msk.bf16.vlgmr.msra.gmra.mxu1 %vm216_vm1, %v2262_v12 }
  0xa2   : > { %302 = vmatpush.bf16.msrb.mxu0 %v278_v5  ;;  %2265 = vmatmul.msk.bf16.vlgmr.msra.gmra.mxu2 %vm216_vm1, %v2262_v12 }
  0xa3   : > { %363 = vmatpush.bf16.msrb.mxu2 %v348_v11  ;;  %315 = vmatpush.bf16.msrb.mxu1 %v280_v6 }
  0xa4   : > { %1102 = vrot.lane.b32.xlu1 %v1094_v53, %s2554_s29  ;;  %1106 = vrot.lane.b32.xlu2 %v1098_v52, %s2554_s29 }
  0xa5   : > { %v337_v7 = vpop.permute.xlu0 %336 }
  0xa6   : > { %v342_v18 = vsel %vm340_vm2, %v335_v59, %v337_v7  ;;  %v416_v19 = vpop.permute.xlu2 %415 }
  0xa7   : > { %v351_v20 = vsel %vm220_vm0, %v342_v18, 0  ;;  %1179 = vrot.lane.b32.xlu0 %v1171_v57, %s2555_s30  ;;  %v420_v21 = vsel %vm417_vm4, %v414_v13, %v416_v19  ;;  %v1327_v24 = vld.sshfl [vmem:[#allocation1 + $0x8] sm:$0xff pattern:$0x73625140] }
  0xa8   : > { %376 = vmatpush.bf16.msrb.mxu3 %v351_v20  ;;  %v431_v23 = vsel %vm220_vm0, %v420_v21, 0  ;;  %v2719_v25 = vld.sshfl [vmem:[#allocation1 + $0x10] sm:$0xff pattern:$0x73625140]  ;;  %v2285_v21 = vld [vmem:[%s3135_s1 + $0x18] sm:$0xf] }
  0xa9   : > { %v2721_v26 = vld.sshfl [vmem:[#allocation1 + $0x18] sm:$0xff pattern:$0x73625140]  ;;  %v1325_v27 = vld.sshfl [vmem:[#allocation1] sm:$0xff pattern:$0x73625140] }
  0xaa   : > { %1401 = vst [vmem:[#allocation1] ss:$4 sm:$0xff] %v2648_v0 }
  0xab   : > { %2271 = vmatmul.msk.bf16.vlgmr.msrb.gmra.mxu3 %vm216_vm1, %v2269_v22 }
  0xac   : > { %466 = vmatpush.bf16.msra.mxu3 %v431_v23  ;;  %1181 = vrot.lane.b32.xlu1 %v1173_v61, %s2555_s30 }
  0xad   : > { %1104 = vrot.lane.b32.xlu2 %v2680_v51, %s2554_s29  ;;  %v339_v28 = vpop.permute.xlu0 %338  ;;  %s2561_s29 = smov 64  }
  0xae   : > { %v412_v29 = vpop.permute.xlu1 %411  ;;  %v343_v30 = vsel %vm340_vm2, %v337_v7, %v339_v28  ;;  %v487_v31 = vpop.permute.xlu2 %486  ;;  %vm1341_vm2 = vcmask 556032  }
  0xaf   : > { %v419_v32 = vsel %vm417_vm4, %v412_v29, %v414_v13  ;;  %v354_v33 = vsel %vm220_vm0, %v343_v30, 0  ;;  %1258 = vrot.lane.b32.xlu0 %v1250_v16, %s2556_s6 }
  0xb0   : > { %v428_v34 = vsel %vm220_vm0, %v419_v32, 0  ;;  %389 = vmatpush.bf16.msra.mxu0 %v354_v33 }
  0xb1   : > { %453 = vmatpush.bf16.msra.mxu2 %v428_v34  ;;  %2267 = vmatmul.msk.bf16.vlgmr.msrb.gmra.mxu0 %vm216_vm1, %v2673_v45  ;;  %v1406_v41 = vld.sshfl [vmem:[#allocation1 + $0x10] sm:$0xff pattern:$0x73625140]  ;;  %v2747_v42 = vld.sshfl [vmem:[#allocation1] sm:$0xff pattern:$0x73625140] }
  0xb2   : > { %2268 = vmatmul.msk.bf16.vlgmr.msrb.gmra.mxu1 %vm216_vm1, %v2673_v45  ;;  %2270 = vmatmul.msk.bf16.vlgmr.msrb.gmra.mxu2 %vm216_vm1, %v2269_v22  ;;  %v1408_v43 = vld.sshfl [vmem:[#allocation1 + $0x18] sm:$0xff pattern:$0x73625140]  ;;  %v1404_v44 = vld.sshfl [vmem:[#allocation1 + $0x8] sm:$0xff pattern:$0x73625140] }
  0xb3   : > { %1478 = vst [vmem:[#allocation1] ss:$4 sm:$0xff] %v2648_v0 }
  0xb4   : > { %1183 = vrot.lane.b32.xlu1 %v2684_v58, %s2555_s30 }
  0xb5   : > { %1256 = vrot.lane.b32.xlu2 %v1248_v15, %s2556_s6 }
  0xb6   : > { %v410_v35 = vpop.permute.xlu1 %409  ;;  %v566_v36 = vpop.permute.xlu2 %565 }
  0xb7   : > { %v418_v37 = vsel %vm417_vm4, %v410_v35, %v412_v29  ;;  %v491_v38 = vpop.permute.xlu0 %490  ;;  %1260 = vrot.lane.b32.xlu0 %v1252_v17, %s2556_s6  ;;  %vm1495_vm4 = vcmask 539648  }
  0xb8   : > { %v425_v39 = vsel %vm220_vm0, %v418_v37, 0 }
  0xb9   : > { %440 = vmatpush.bf16.msra.mxu1 %v425_v39 }
  0xba   : > { %v1479_v56 = vld.sshfl [vmem:[#allocation1] sm:$0xff pattern:$0x73625140]  ;;  %v2764_v57 = vld.sshfl [vmem:[#allocation1 + $0x8] sm:$0xff pattern:$0x73625140] }
  0xbb   : > { %2276 = vmatmul.msk.bf16.vlgmr.msra.gmra.mxu3 %vm216_vm1, %v2273_v40  ;;  %v2767_v58 = vld.sshfl [vmem:[#allocation1 + $0x10] sm:$0xff pattern:$0x73625140]  ;;  %v2769_v59 = vld.sshfl [vmem:[#allocation1 + $0x18] sm:$0xff pattern:$0x73625140] }
  0xbc   : > { %1335 = vrot.lane.b32.xlu1 %v1327_v24, %s2557_s9  ;;  %1555 = vst [vmem:[#allocation1] ss:$4 sm:$0xff] %v2648_v0 }
  0xbd   : > { %1185 = vrot.lane.b32.xlu2 %v2686_v60, %s2555_s30  ;;  %s2165_s30 = scalar_lea.sflag [#allocation3], %s175_s18 }
  0xbe   : > { %v493_v45 = vpop.permute.xlu1 %492  ;;  %v568_v46 = vpop.permute.xlu2 %567 }
  0xbf   : > { %v497_v47 = vsel %vm494_vm5, %v491_v38, %v493_v45  ;;  %v489_v48 = vpop.permute.xlu0 %488  ;;  %1262 = vrot.lane.b32.xlu0 %v2703_v14, %s2556_s6  ;;  %v573_v49 = vsel %vm571_vm6, %v566_v36, %v568_v46 }
  0xc0   : > { %v508_v50 = vsel %vm220_vm0, %v497_v47, 0  ;;  %v496_v51 = vsel %vm494_vm5, %v489_v48, %v491_v38  ;;  %v495_v52 = vsel %vm494_vm5, %v487_v31, %v489_v48  ;;  %v582_v55 = vsel %vm220_vm0, %v573_v49, 0 }
  0xc1   : > { %v505_v53 = vsel %vm220_vm0, %v496_v51, 0  ;;  %v502_v54 = vsel %vm220_vm0, %v495_v52, 0  ;;  %543 = vmatpush.bf16.msrb.mxu2 %v508_v50  ;;  %2272 = vmatmul.msk.bf16.vlgmr.msra.gmra.mxu0 %vm216_vm1, %v2269_v22  ;;  %vm1572_vm5 = vcmask 531456  }
  0xc2   : > { %530 = vmatpush.bf16.msrb.mxu1 %v505_v53  ;;  %2275 = vmatmul.msk.bf16.vlgmr.msra.gmra.mxu2 %vm216_vm1, %v2273_v40 }
  0xc3   : > { %2274 = vmatmul.msk.bf16.vlgmr.msra.gmra.mxu1 %vm216_vm1, %v2273_v40  ;;  %517 = vmatpush.bf16.msrb.mxu0 %v502_v54  ;;  %v2787_v8 = vld.sshfl [vmem:[#allocation1 + $0x18] sm:$0xff pattern:$0x73625140]  ;;  %v1558_v11 = vld.sshfl [vmem:[#allocation1 + $0x8] sm:$0xff pattern:$0x73625140] }
  0xc4   : > { %1333 = vrot.lane.b32.xlu1 %v1325_v27, %s2557_s9  ;;  %v1556_v12 = vld.sshfl [vmem:[#allocation1] sm:$0xff pattern:$0x73625140]  ;;  %v1560_v6 = vld.sshfl [vmem:[#allocation1 + $0x10] sm:$0xff pattern:$0x73625140] }
  0xc5   : > { %1337 = vrot.lane.b32.xlu2 %v2719_v25, %s2557_s9  ;;  %1632 = vst [vmem:[#allocation1] ss:$4 sm:$0xff] %v2648_v0 }
  0xc6   : > { %v564_v60 = vpop.permute.xlu1 %563  ;;  %v720_v61 = vpop.permute.xlu2 %719 }
  0xc7   : > { %607 = vmatpush.bf16.msra.mxu0 %v582_v55  ;;  %v572_v62 = vsel %vm571_vm6, %v564_v60, %v566_v36  ;;  %1414 = vrot.lane.b32.xlu0 %v1406_v41, %s2558_s10 }
  0xc8   : > { %v579_v63 = vsel %vm220_vm0, %v572_v62, 0 }
  0xc9   : > { %v641_v1 = vpop.permute.xlu0 %640  ;;  %594 = vmatpush.bf16.msrb.mxu3 %v579_v63 }
  0xcc   : > { %2282 = vmatmul.msk.bf16.vlgmr.msrb.gmra.mxu3 %vm216_vm1, %v2281_v2  ;;  %1416 = vrot.lane.b32.xlu1 %v1408_v43, %s2558_s10  ;;  %v2809_v23 = vld.sshfl [vmem:[#allocation1] sm:$0xff pattern:$0x73625140]  ;;  %v1635_v24 = vld.sshfl [vmem:[#allocation1 + $0x8] sm:$0xff pattern:$0x73625140] }
  0xcd   : > { %1339 = vrot.lane.b32.xlu2 %v2721_v26, %s2557_s9  ;;  %v1637_v26 = vld.sshfl [vmem:[#allocation1 + $0x10] sm:$0xff pattern:$0x73625140]  ;;  %v1639_v28 = vld.sshfl [vmem:[#allocation1 + $0x18] sm:$0xff pattern:$0x73625140] }
  0xce   : > { %v643_v3 = vpop.permute.xlu1 %642  ;;  %v718_v5 = vpop.permute.xlu2 %717  ;;  %1709 = vst [vmem:[#allocation1] ss:$4 sm:$0xff] %v2648_v0 }
  0xcf   : > { %v649_v9 = vsel %vm648_vm7, %v641_v1, %v643_v3  ;;  %1412 = vrot.lane.b32.xlu0 %v1404_v44, %s2558_s10  ;;  %v726_v10 = vsel %vm725_vm8, %v718_v5, %v720_v61  ;;  %v2289_v44 = vld [vmem:[%s3135_s1 + $0x1c] sm:$0xf] }
  0xd0   : > { %v656_v13 = vsel %vm220_vm0, %v649_v9, 0  ;;  %v733_v16 = vsel %vm220_vm0, %v726_v10, 0 }
  0xd1   : > { %v570_v14 = vpop.permute.xlu0 %569  ;;  %671 = vmatpush.bf16.msra.mxu2 %v656_v13  ;;  %2278 = vmatmul.msk.bf16.vlgmr.msrb.gmra.mxu0 %vm216_vm1, %v2277_v4 }
  0xd2   : > { %v574_v15 = vsel %vm571_vm6, %v568_v46, %v570_v14  ;;  %2280 = vmatmul.msk.bf16.vlgmr.msrb.gmra.mxu2 %vm216_vm1, %v2277_v4  ;;  %vm1649_vm6 = vcmask 523264  }
  0xd3   : > { %v585_v17 = vsel %vm220_vm0, %v574_v15, 0  ;;  %2279 = vmatmul.msk.bf16.vlgmr.msrb.gmra.mxu1 %vm216_vm1, %v2277_v4  ;;  %v2293_v15 = vld [vmem:[%s3135_s1 + $0x20] sm:$0xf] }
  0xd4   : > { %620 = vmatpush.bf16.msra.mxu1 %v585_v17  ;;  %1487 = vrot.lane.b32.xlu1 %v1479_v56, %s2559_s23 }
  0xd5   : > { %1410 = vrot.lane.b32.xlu2 %v2747_v42, %s2558_s10  ;;  %v1716_v39 = vld.sshfl [vmem:[#allocation1 + $0x18] sm:$0xff pattern:$0x73625140]  ;;  %v1714_v40 = vld.sshfl [vmem:[#allocation1 + $0x10] sm:$0xff pattern:$0x73625140] }
  0xd6   : > { %v645_v7 = vpop.permute.xlu1 %644  ;;  %v801_v18 = vpop.permute.xlu2 %800  ;;  %v1712_v42 = vld.sshfl [vmem:[#allocation1 + $0x8] sm:$0xff pattern:$0x73625140]  ;;  %v1710_v45 = vld.sshfl [vmem:[#allocation1] sm:$0xff pattern:$0x73625140] }
  0xd7   : > { %v650_v19 = vsel %vm648_vm7, %v643_v3, %v645_v7  ;;  %1564 = vrot.lane.b32.xlu0 %v1556_v12, %s2560_s26  ;;  %1786 = vst [vmem:[#allocation1] ss:$4 sm:$0xff] %v2648_v0  ;;  %v2863_v3 = vld [vmem:[%s3135_s1 + $0x24] sm:$0xf]  ;;  %s2563_s10 = smov 47  }
  0xd8   : > { %748 = vmatpush.bf16.msrb.mxu1 %v733_v16  ;;  %v659_v20 = vsel %vm220_vm0, %v650_v19, 0 }
  0xd9   : > { %v722_v22 = vpop.permute.xlu0 %721  ;;  %684 = vmatpush.bf16.msra.mxu3 %v659_v20 }
  0xda   : > { %v727_v25 = vsel %vm725_vm8, %v720_v61, %v722_v22 }
  0xdb   : > { %v736_v27 = vsel %vm220_vm0, %v727_v25, 0  ;;  %v2301_v25 = vld [vmem:[%s3135_s1 + $0x28] sm:$0xf] }
  0xdc   : > { %2287 = vmatmul.msk.bf16.vlgmr.msra.gmra.mxu3 %vm216_vm1, %v2285_v21  ;;  %761 = vmatpush.bf16.msrb.mxu2 %v736_v27 }
  0xdd   : > { %1566 = vrot.lane.b32.xlu1 %v1558_v11, %s2560_s26  ;;  %1489 = vrot.lane.b32.xlu2 %v2764_v57, %s2559_s23 }
  0xde   : > { %v647_v29 = vpop.permute.xlu1 %646  ;;  %v872_v30 = vpop.permute.xlu2 %871  ;;  %v1787_v54 = vld.sshfl [vmem:[#allocation1] sm:$0xff pattern:$0x73625140]  ;;  %v1791_v55 = vld.sshfl [vmem:[#allocation1 + $0x10] sm:$0xff pattern:$0x73625140] }
  0xdf   : > { %v651_v31 = vsel %vm648_vm7, %v645_v7, %v647_v29  ;;  %1493 = vrot.lane.b32.xlu0 %v2769_v59, %s2559_s23  ;;  %v1789_v60 = vld.sshfl [vmem:[#allocation1 + $0x8] sm:$0xff pattern:$0x73625140]  ;;  %v2882_v7 = vpop.f32.mrf.mxu3  ;;  %vm1726_vm7 = vcmask 392192  }
  0xe0   : > { %v662_v32 = vsel %vm220_vm0, %v651_v31, 0 }
  0xe1   : > { %v724_v33 = vpop.permute.xlu0 %723  ;;  %697 = vmatpush.bf16.msrb.mxu0 %v662_v32 }
  0xe2   : > { %v728_v34 = vsel %vm725_vm8, %v722_v22, %v724_v33  ;;  %2283 = vmatmul.msk.bf16.vlgmr.msra.gmra.mxu0 %vm216_vm1, %v2281_v2  ;;  %2286 = vmatmul.msk.bf16.vlgmr.msra.gmra.mxu2 %vm216_vm1, %v2285_v21  ;;  %vm1803_vm8 = vcmask 384000  }
  0xe3   : > { %v739_v35 = vsel %vm220_vm0, %v728_v34, 0  ;;  %2284 = vmatmul.msk.bf16.vlgmr.msra.gmra.mxu1 %vm216_vm1, %v2281_v2 }
  0xe4   : > { %774 = vmatpush.bf16.msrb.mxu3 %v739_v35 }
  0xe5   : > { %1568 = vrot.lane.b32.xlu1 %v1560_v6, %s2560_s26  ;;  %1491 = vrot.lane.b32.xlu2 %v2767_v58, %s2559_s23  ;;  %v2851_v58 = vld.sshfl [vmem:[#allocation1 + $0x18] sm:$0xff pattern:$0x73625140] }
  0xe6   : > { %v799_v36 = vpop.permute.xlu1 %798  ;;  %v951_v37 = vpop.permute.xlu2 %950  ;;  %1863 = vst [vmem:[#allocation1] ss:$4 sm:$0xff] %v2648_v0 }
  0xe7   : > { %v805_v38 = vsel %vm802_vm9, %v799_v36, %v801_v18  ;;  %1645 = vrot.lane.b32.xlu0 %v1637_v26, %s2561_s29 }
  0xe8   : > { %v816_v41 = vsel %vm220_vm0, %v805_v38, 0 }
  0xe9   : > { %v795_v43 = vpop.permute.xlu0 %794  ;;  %851 = vmatpush.bf16.msra.mxu2 %v816_v41 }
  0xec   : > { %2292 = vmatmul.msk.bf16.vlgmr.msrb.gmra.mxu3 %vm216_vm1, %v2289_v44 }
  0xed   : > { %1570 = vrot.lane.b32.xlu1 %v2787_v8, %s2560_s26  ;;  %1643 = vrot.lane.b32.xlu2 %v1635_v24, %s2561_s29  ;;  %v1866_v8 = vld.sshfl [vmem:[#allocation1 + $0x8] sm:$0xff pattern:$0x73625140]  ;;  %v2869_v9 = vld.sshfl [vmem:[#allocation1 + $0x10] sm:$0xff pattern:$0x73625140] }
  0xee   : > { %v797_v46 = vpop.permute.xlu1 %796  ;;  %v953_v47 = vpop.permute.xlu2 %952  ;;  %v2871_v10 = vld.sshfl [vmem:[#allocation1 + $0x18] sm:$0xff pattern:$0x73625140]  ;;  %v1864_v12 = vld.sshfl [vmem:[#allocation1] sm:$0xff pattern:$0x73625140] }
  0xef   : > { %v804_v48 = vsel %vm802_vm9, %v797_v46, %v799_v36  ;;  %v803_v49 = vsel %vm802_vm9, %v795_v43, %v797_v46  ;;  %1647 = vrot.lane.b32.xlu0 %v1639_v28, %s2561_s29  ;;  %v958_v50 = vsel %vm956_vm10, %v951_v37, %v953_v47  ;;  %1940 = vst [vmem:[#allocation1] ss:$4 sm:$0xff] %v2648_v0  ;;  %vm1880_vm9 = vcmask 375808  }
  0xf0   : > { %v813_v51 = vsel %vm220_vm0, %v804_v48, 0  ;;  %v810_v52 = vsel %vm220_vm0, %v803_v49, 0  ;;  %v967_v57 = vsel %vm220_vm0, %v958_v50, 0 }
  0xf1   : > { %838 = vmatpush.bf16.msra.mxu1 %v813_v51  ;;  %v874_v53 = vpop.permute.xlu0 %873  ;;  %825 = vmatpush.bf16.msra.mxu0 %v810_v52 }
  0xf2   : > { %2288 = vmatmul.msk.bf16.vlgmr.msrb.gmra.mxu0 %vm216_vm1, %v2285_v21  ;;  %2291 = vmatmul.msk.bf16.vlgmr.msrb.gmra.mxu2 %vm216_vm1, %v2289_v44  ;;  %v880_v56 = vsel %vm879_vm11, %v872_v30, %v874_v53 }
  0xf3   : > { %2290 = vmatmul.msk.bf16.vlgmr.msrb.gmra.mxu1 %vm216_vm1, %v2289_v44  ;;  %v887_v59 = vsel %vm220_vm0, %v880_v56, 0  ;;  %v2305_v44 = vld [vmem:[%s3135_s1 + $0x2c] sm:$0xf] }
  0xf4   : > { %902 = vmatpush.bf16.msra.mxu3 %v887_v59 }
  0xf5   : > { %1722 = vrot.lane.b32.xlu1 %v1714_v40, %s2562_s5  ;;  %1641 = vrot.lane.b32.xlu2 %v2809_v23, %s2561_s29  ;;  %v293_v23 = vpop.f32.mrf.mxu3 }
  0xf6   : > { %v949_v61 = vpop.permute.xlu1 %948  ;;  %v955_v62 = vpop.permute.xlu2 %954  ;;  %v1943_v28 = vld.sshfl [vmem:[#allocation1 + $0x8] sm:$0xff pattern:$0x73625140]  ;;  %v1945_v29 = vld.sshfl [vmem:[#allocation1 + $0x10] sm:$0xff pattern:$0x73625140] }
  0xf7   : > { %v957_v63 = vsel %vm956_vm10, %v949_v61, %v951_v37  ;;  %1718 = vrot.lane.b32.xlu0 %v1710_v45, %s2562_s5  ;;  %v959_v11 = vsel %vm956_vm10, %v953_v47, %v955_v62  ;;  %v1941_v30 = vld.sshfl [vmem:[#allocation1] sm:$0xff pattern:$0x73625140]  ;;  %v1947_v31 = vld.sshfl [vmem:[#allocation1 + $0x18] sm:$0xff pattern:$0x73625140] }
  0xf8   : > { %992 = vmatpush.bf16.msrb.mxu3 %v967_v57  ;;  %v964_v1 = vsel %vm220_vm0, %v957_v63, 0  ;;  %v970_v17 = vsel %vm220_vm0, %v959_v11, 0  ;;  %2017 = vst [vmem:[#allocation1] ss:$4 sm:$0xff] %v2648_v0  ;;  %vm1957_vm10 = vcmask 367616  }
  0xf9   : > { %v876_v2 = vpop.permute.xlu0 %875  ;;  %979 = vmatpush.bf16.msrb.mxu2 %v964_v1 }
  0xfa   : > { %v881_v4 = vsel %vm879_vm11, %v874_v53, %v876_v2 }
  0xfb   : > { %v890_v5 = vsel %vm220_vm0, %v881_v4, 0 }
  0xfc   : > { %2298 = vmatmul.msk.bf16.vlgmr.msra.gmra.mxu3 %vm216_vm1, %v2863_v3  ;;  %915 = vmatpush.bf16.msrb.mxu0 %v890_v5  ;;  %v2942_v5 = vld [vmem:[%s3135_s1 + $0x34] sm:$0xf] }
  0xfd   : > { %1720 = vrot.lane.b32.xlu1 %v1712_v42, %s2562_s5  ;;  %1724 = vrot.lane.b32.xlu2 %v1716_v39, %s2562_s5 }
  0xfe   : > { %v878_v13 = vpop.permute.xlu1 %877  ;;  %v1107_v6 = vpop.permute.xlu2 %1106 }
  0xff   : > { %v882_v14 = vsel %vm879_vm11, %v876_v2, %v878_v13  ;;  %1797 = vrot.lane.b32.xlu0 %v1789_v60, %s2563_s10  ;;  %v2024_v46 = vld.sshfl [vmem:[#allocation1 + $0x18] sm:$0xff pattern:$0x73625140]  ;;  %v2018_v57 = vld.sshfl [vmem:[#allocation1] sm:$0xff pattern:$0x73625140] }
 0x100   : > { %v893_v16 = vsel %vm220_vm0, %v882_v14, 0  ;;  %vm2034_vm11 = vcmask 359424  }
 0x101   : > { %v1028_v18 = vpop.permute.xlu0 %1027  ;;  %928 = vmatpush.bf16.msrb.mxu1 %v893_v16 }
 0x102   : > { %2294 = vmatmul.msk.bf16.vlgmr.msra.gmra.mxu0 %vm216_vm1, %v2293_v15  ;;  %2296 = vmatmul.msk.bf16.vlgmr.msra.gmra.mxu2 %vm216_vm1, %v2293_v15 }
 0x103   : > { %2295 = vmatmul.msk.bf16.vlgmr.msra.gmra.mxu1 %vm216_vm1, %v2293_v15  ;;  %1005 = vmatpush.bf16.msra.mxu0 %v970_v17  ;;  %v2309_v17 = vld [vmem:[%s3135_s1 + $0x30] sm:$0xf] }
 0x105   : > { %1872 = vrot.lane.b32.xlu1 %v1864_v12, %s2564_s11  ;;  %1795 = vrot.lane.b32.xlu2 %v1787_v54, %s2563_s10 }
 0x106   : > { %v1030_v19 = vpop.permute.xlu1 %1029 }
 0x107   : > { %v1105_v20 = vpop.permute.xlu2 %1104  ;;  %v1035_v21 = vsel %vm1033_vm12, %v1028_v18, %v1030_v19  ;;  %1799 = vrot.lane.b32.xlu0 %v1791_v55, %s2563_s10 }
 0x108   : > { %v1044_v22 = vsel %vm220_vm0, %v1035_v21, 0  ;;  %v1112_v33 = vsel %vm1110_vm13, %v1105_v20, %v1107_v6 }
 0x109   : > { %v1026_v24 = vpop.permute.xlu0 %1025  ;;  %1069 = vmatpush.bf16.msra.mxu2 %v1044_v22  ;;  %v1121_v38 = vsel %vm220_vm0, %v1112_v33, 0 }
 0x10a   : > { %v1034_v26 = vsel %vm1033_vm12, %v1026_v24, %v1028_v18 }
 0x10b   : > { %v1041_v27 = vsel %vm220_vm0, %v1034_v26, 0  ;;  %v2020_v26 = vld.sshfl [vmem:[#allocation1 + $0x8] sm:$0xff pattern:$0x73625140] }
 0x10c   : > { %2303 = vmatmul.msk.bf16.vlgmr.msrb.gmra.mxu3 %vm216_vm1, %v2301_v25  ;;  %1056 = vmatpush.bf16.msra.mxu1 %v1041_v27 }
 0x10d   : > { %1801 = vrot.lane.b32.xlu1 %v2851_v58, %s2563_s10  ;;  %1874 = vrot.lane.b32.xlu2 %v1866_v8, %s2564_s11 }
 0x10e   : > { %v1032_v32 = vpop.permute.xlu1 %1031 }
 0x10f   : > { %v1257_v34 = vpop.permute.xlu2 %1256  ;;  %v1036_v35 = vsel %vm1033_vm12, %v1030_v19, %v1032_v32  ;;  %1951 = vrot.lane.b32.xlu0 %v1943_v28, %s2565_s21 }
 0x110   : > { %v1047_v36 = vsel %vm220_vm0, %v1036_v35, 0 }
 0x111   : > { %1082 = vmatpush.bf16.msra.mxu3 %v1047_v36  ;;  %v1109_v37 = vpop.permute.xlu0 %1108  ;;  %v2317_v36 = vld [vmem:[%s3135_s1 + $0x38] sm:$0xf] }
 0x112   : > { %2299 = vmatmul.msk.bf16.vlgmr.msrb.gmra.mxu0 %vm216_vm1, %v2863_v3  ;;  %2302 = vmatmul.msk.bf16.vlgmr.msrb.gmra.mxu2 %vm216_vm1, %v2301_v25  ;;  %v1113_v39 = vsel %vm1110_vm13, %v1107_v6, %v1109_v37 }
 0x113   : > { %2300 = vmatmul.msk.bf16.vlgmr.msrb.gmra.mxu1 %vm216_vm1, %v2863_v3  ;;  %v1124_v0 = vsel %vm220_vm0, %v1113_v39, 0  ;;  %v2022_v3 = vld.sshfl [vmem:[#allocation1 + $0x10] sm:$0xff pattern:$0x73625140] }
 0x114   : > { %1146 = vmatpush.bf16.msrb.mxu1 %v1121_v38  ;;  %1159 = vmatpush.bf16.msrb.mxu2 %v1124_v0 }
 0x115   : > { %1953 = vrot.lane.b32.xlu1 %v1945_v29, %s2565_s21  ;;  %1876 = vrot.lane.b32.xlu2 %v2869_v9, %s2564_s11 }
 0x116   : > { %v1103_v40 = vpop.permute.xlu1 %1102 }
 0x117   : > { %v1186_v41 = vpop.permute.xlu2 %1185  ;;  %v1111_v42 = vsel %vm1110_vm13, %v1103_v40, %v1105_v20  ;;  %1949 = vrot.lane.b32.xlu0 %v1941_v30, %s2565_s21 }
 0x118   : > { %v1118_v43 = vsel %vm220_vm0, %v1111_v42, 0 }
 0x119   : > { %v1180_v45 = vpop.permute.xlu0 %1179  ;;  %1133 = vmatpush.bf16.msrb.mxu0 %v1118_v43 }
 0x11c   : > { %2308 = vmatmul.msk.bf16.vlgmr.msra.gmra.mxu3 %vm216_vm1, %v2305_v44 }
 0x11d   : > { %1955 = vrot.lane.b32.xlu1 %v1947_v31, %s2565_s21  ;;  %1878 = vrot.lane.b32.xlu2 %v2871_v10, %s2564_s11  ;;  %s2369_s21 = smul.u32 24, %s2533_s15 }
 0x11e   : > { %v239_v47 = vpop.f32.mrf.mxu0  ;;  %v252_v48 = vpop.f32.mrf.mxu1 }
 0x11f   : > { %v2924_v49 = vadd.f32 %v2882_v7, %v239_v47  ;;  %v1182_v50 = vpop.permute.xlu1 %1181  ;;  %v1338_v51 = vpop.permute.xlu2 %1337  ;;  %2032 = vrot.lane.b32.xlu0 %v2024_v46, %s2566_s27  ;;  %s2178_s26 = scalar_lea.hbm %s3137_s3, %s2369_s21 }
 0x120   : > { %v1188_v52 = vsel %vm1187_vm14, %v1180_v45, %v1182_v50  ;;  %s2182_s29 = sshll.u32 %s2178_s26, 4  ;;  %s2183_s29 = int_to_ptr.hbm [resolvable:$true] %s2182_s29 }
 0x121   : > { %v1195_v53 = vsel %vm220_vm0, %v1188_v52, 0  ;;  %v1259_v54 = vpop.permute.xlu0 %1258  ;;  %s2477_s4 = sshra.s32 %s2183_s29, 4  ;;  %s2478_s4 = int_to_ptr.hbm [resolvable:$true] %s2477_s4 }
 0x122   : > { %2304 = vmatmul.msk.bf16.vlgmr.msra.gmra.mxu0 %vm216_vm1, %v2301_v25  ;;  %2307 = vmatmul.msk.bf16.vlgmr.msra.gmra.mxu2 %vm216_vm1, %v2305_v44  ;;  %v1265_v55 = vsel %vm1264_vm15, %v1257_v34, %v1259_v54  ;;  %s2479_s5 = scalar_lea.hbm %s2478_s4, 24  ;;  %p2484_p1 = scmp.lt.s32.totalorder %s2478_s4, %s3137_s3 }
 0x123   : > { %2306 = vmatmul.msk.bf16.vlgmr.msra.gmra.mxu1 %vm216_vm1, %v2305_v44  ;;  %v1272_v56 = vsel %vm220_vm0, %v1265_v55, 0  ;;  %1210 = vmatpush.bf16.msrb.mxu3 %v1195_v53  ;;  %p2480_p12 = scmp.ne.s32.totalorder %s2478_s4, %s2479_s5  ;;  %p2485_p2 = scmp.lt.s32.totalorder %s2483_s8, %s2479_s5 }
 0x124   : > { %1287 = vmatpush.bf16.msra.mxu2 %v1272_v56 }
 0x125   : > { %v265_v58 = vpop.f32.mrf.mxu2  ;;  %2026 = vrot.lane.b32.xlu1 %v2018_v57, %s2566_s27  ;;  %2030 = vrot.lane.b32.xlu2 %v2022_v3, %s2566_s27  ;;  %p2481_p13 = pnand %p2480_p12, %p2628_p4  ;;  %p2486_p3 = por %p2485_p2, %p2484_p1 }
 0x126   : > { %v241_v59 = vpop.f32.mrf.mxu0  ;;  %v254_v60 = vpop.f32.mrf.mxu1 }
 0x127   : > { %v1184_v61 = vpop.permute.xlu1 %1183  ;;  %v1340_v62 = vpop.permute.xlu2 %1339  ;;  %p2482_p0 = pneg %p2481_p13 }
 0x128   : > { %v1189_v63 = vsel %vm1187_vm14, %v1182_v50, %v1184_v61  ;;  %v1190_v1 = vsel %vm1187_vm14, %v1184_v61, %v1186_v41  ;;  %v1344_v2 = vsel %vm1341_vm2, %v1338_v51, %v1340_v62  ;;  %v2321_v61 = vld [vmem:[%s3135_s1 + $0x3c] sm:$0xf] }
 0x129   : > { %v1198_v4 = vsel %vm220_vm0, %v1189_v63, 0  ;;  %v1261_v8 = vpop.permute.xlu0 %1260  ;;  %v1201_v9 = vsel %vm220_vm0, %v1190_v1, 0  ;;  %v1355_v12 = vsel %vm220_vm0, %v1344_v2, 0  ;;  %p2487_p5 = pnand %p2486_p3, %p2482_p0 }
 0x12a   : > { %v1266_v10 = vsel %vm1264_vm15, %v1259_v54, %v1261_v8  ;;  %1223 = vmatpush.bf16.msra.mxu0 %v1198_v4  ;;  %1236 = vmatpush.bf16.msra.mxu1 %v1201_v9 }
 0x12b   : > { %v1275_v11 = vsel %vm220_vm0, %v1266_v10, 0 }
 0x12c   : > { %2314 = vmatmul.msk.bf16.vlgmr.msrb.gmra.mxu3 %vm216_vm1, %v2942_v5 }
 0x12d   : > { %v267_v13 = vpop.f32.mrf.mxu2  ;;  %1300 = vmatpush.bf16.msra.mxu3 %v1275_v11  ;;  %2028 = vrot.lane.b32.xlu2 %v2020_v26, %s2566_s27  ;;  %s177_s27 = scalar_lea.vmem [#allocation2], %s2368_s19 }
 0x12e   : > { %v304_v6 = vpop.f32.mrf.mxu0  ;;  %v378_v14 = vpop.f32.mrf.mxu3  ;;  %s2180_s28 = sshll.u32 %s177_s27, 4  ;;  %s2181_s28 = int_to_ptr.vmem [resolvable:$true] %s2180_s28 }
 0x12f   : > { %v305_v15 = vadd.f32 %v304_v6, %v252_v48  ;;  %v317_v16 = vpop.f32.mrf.mxu1  ;;  %v1336_v7 = vpop.permute.xlu1 %1335 }
 0x130   : > { %v318_v18 = vadd.f32 %v317_v16, %v265_v58  ;;  %v1343_v19 = vsel %vm1341_vm2, %v1336_v7, %v1338_v51  ;;  %v1411_v20 = vpop.permute.xlu2 %1410 }
 0x131   : > { %1390 = vmatpush.bf16.msrb.mxu3 %v1355_v12  ;;  %v396_v21 = vadd.f32 %v378_v14, %v305_v15  ;;  %v1352_v22 = vsel %vm220_vm0, %v1343_v19, 0  ;;  %v1263_v23 = vpop.permute.xlu0 %1262 }
 0x132   : > { %2310 = vmatmul.msk.bf16.vlgmr.msrb.gmra.mxu0 %vm216_vm1, %v2309_v17  ;;  %2312 = vmatmul.msk.bf16.vlgmr.msrb.gmra.mxu2 %vm216_vm1, %v2309_v17  ;;  %v1267_v24 = vsel %vm1264_vm15, %v1261_v8, %v1263_v23 }
 0x133   : > { %2311 = vmatmul.msk.bf16.vlgmr.msrb.gmra.mxu1 %vm216_vm1, %v2309_v17  ;;  %v1278_v25 = vsel %vm220_vm0, %v1267_v24, 0  ;;  %1377 = vmatpush.bf16.msrb.mxu2 %v1352_v22 }
 0x134   : > { %1313 = vmatpush.bf16.msrb.mxu0 %v1278_v25  ;;  %v2996_v25 = vld [vmem:[%s3135_s1 + $0x44] sm:$0xf] }
 0x135   : > { %v365_v27 = vpop.f32.mrf.mxu2 }
 0x136   : > { %v395_v28 = vadd.f32 %v365_v27, %v2924_v49  ;;  %v306_v29 = vpop.f32.mrf.mxu0  ;;  %v380_v30 = vpop.f32.mrf.mxu3 }
 0x137   : > { %v319_v31 = vpop.f32.mrf.mxu1  ;;  %v1334_v32 = vpop.permute.xlu1 %1333 }
 0x138   : > { %v1342_v33 = vsel %vm1341_vm2, %v1334_v32, %v1336_v7  ;;  %v1490_v34 = vpop.permute.xlu2 %1489 }
 0x139   : > { %v1349_v35 = vsel %vm220_vm0, %v1342_v33, 0  ;;  %v1415_v37 = vpop.permute.xlu0 %1414  ;;  %v2325_v33 = vld [vmem:[%s3135_s1 + $0x40] sm:$0xf] }
 0x13a   : > { %1364 = vmatpush.bf16.msrb.mxu1 %v1349_v35 }
 0x13c   : > { %2319 = vmatmul.msk.bf16.vlgmr.msra.gmra.mxu3 %vm216_vm1, %v2317_v36 }
 0x13d   : > { %v367_v38 = vpop.f32.mrf.mxu2 }
 0x13e   : > { %v391_v39 = vpop.f32.mrf.mxu0  ;;  %v468_v0 = vpop.f32.mrf.mxu3 }
 0x13f   : > { %v397_v40 = vadd.f32 %v391_v39, %v318_v18  ;;  %v1417_v41 = vpop.permute.xlu1 %1416 }
 0x140   : > { %v442_v42 = vpop.f32.mrf.mxu1  ;;  %v1421_v43 = vsel %vm1418_vm3, %v1415_v37, %v1417_v41  ;;  %v1492_v44 = vpop.permute.xlu2 %1491 }
 0x141   : > { %v472_v45 = vadd.f32 %v442_v42, %v395_v28  ;;  %v474_v46 = vadd.f32 %v468_v0, %v397_v40  ;;  %v1432_v47 = vsel %vm220_vm0, %v1421_v43, 0  ;;  %v1413_v48 = vpop.permute.xlu0 %1412  ;;  %v1497_v2 = vsel %vm1495_vm4, %v1490_v34, %v1492_v44 }
 0x142   : > { %2315 = vmatmul.msk.bf16.vlgmr.msra.gmra.mxu0 %vm216_vm1, %v2942_v5  ;;  %2318 = vmatmul.msk.bf16.vlgmr.msra.gmra.mxu2 %vm216_vm1, %v2317_v36  ;;  %v1420_v49 = vsel %vm1418_vm3, %v1413_v48, %v1415_v37  ;;  %v1419_v50 = vsel %vm1418_vm3, %v1411_v20, %v1413_v48  ;;  %v1506_v11 = vsel %vm220_vm0, %v1497_v2, 0 }
 0x143   : > { %2316 = vmatmul.msk.bf16.vlgmr.msra.gmra.mxu1 %vm216_vm1, %v2942_v5  ;;  %v1429_v51 = vsel %vm220_vm0, %v1420_v49, 0  ;;  %v1426_v52 = vsel %vm220_vm0, %v1419_v50, 0  ;;  %1467 = vmatpush.bf16.msra.mxu2 %v1432_v47 }
 0x144   : > { %1454 = vmatpush.bf16.msra.mxu1 %v1429_v51  ;;  %1441 = vmatpush.bf16.msra.mxu0 %v1426_v52  ;;  %v2333_v52 = vld [vmem:[%s3135_s1 + $0x48] sm:$0xf] }
 0x145   : > { %v455_v53 = vpop.f32.mrf.mxu2 }
 0x146   : > { %v473_v54 = vadd.f32 %v455_v53, %v396_v21  ;;  %v393_v55 = vpop.f32.mrf.mxu0  ;;  %v470_v56 = vpop.f32.mrf.mxu3 }
 0x147   : > { %v1488_v57 = vpop.permute.xlu1 %1487 }
 0x148   : > { %v444_v58 = vpop.f32.mrf.mxu1  ;;  %v1496_v59 = vsel %vm1495_vm4, %v1488_v57, %v1490_v34  ;;  %v1644_v60 = vpop.permute.xlu2 %1643 }
 0x149   : > { %v1503_v62 = vsel %vm220_vm0, %v1496_v59, 0  ;;  %v1565_v63 = vpop.permute.xlu0 %1564 }
 0x14a   : > { %1518 = vmatpush.bf16.msra.mxu3 %v1503_v62 }
 0x14c   : > { %2324 = vmatmul.msk.bf16.vlgmr.msrb.gmra.mxu3 %vm216_vm1, %v2321_v61 }
 0x14d   : > { %v457_v1 = vpop.f32.mrf.mxu2 }
 0x14e   : > { %v519_v3 = vpop.f32.mrf.mxu0 }
 0x14f   : > { %v549_v4 = vadd.f32 %v519_v3, %v472_v45  ;;  %v596_v5 = vpop.f32.mrf.mxu3  ;;  %v1567_v8 = vpop.permute.xlu1 %1566 }
 0x150   : > { %v532_v9 = vpop.f32.mrf.mxu1  ;;  %v1573_v10 = vsel %vm1572_vm5, %v1565_v63, %v1567_v8  ;;  %v1642_v12 = vpop.permute.xlu2 %1641 }
 0x151   : > { %v550_v13 = vadd.f32 %v532_v9, %v473_v54  ;;  %v626_v6 = vadd.f32 %v596_v5, %v549_v4  ;;  %v1580_v14 = vsel %vm220_vm0, %v1573_v10, 0  ;;  %v1494_v15 = vpop.permute.xlu0 %1493  ;;  %v1650_v30 = vsel %vm1649_vm6, %v1642_v12, %v1644_v60 }
 0x152   : > { %2320 = vmatmul.msk.bf16.vlgmr.msrb.gmra.mxu0 %vm216_vm1, %v2317_v36  ;;  %2323 = vmatmul.msk.bf16.vlgmr.msrb.gmra.mxu2 %vm216_vm1, %v2321_v61  ;;  %v1498_v16 = vsel %vm1495_vm4, %v1492_v44, %v1494_v15  ;;  %v1657_v0 = vsel %vm220_vm0, %v1650_v30, 0 }
 0x153   : > { %2322 = vmatmul.msk.bf16.vlgmr.msrb.gmra.mxu1 %vm216_vm1, %v2321_v61  ;;  %v1509_v17 = vsel %vm220_vm0, %v1498_v16, 0  ;;  %1531 = vmatpush.bf16.msrb.mxu0 %v1506_v11 }
 0x154   : > { %1595 = vmatpush.bf16.msrb.mxu2 %v1580_v14  ;;  %1544 = vmatpush.bf16.msrb.mxu1 %v1509_v17 }
 0x155   : > { %v545_v7 = vpop.f32.mrf.mxu2 }
 0x156   : > { %v551_v18 = vadd.f32 %v545_v7, %v474_v46  ;;  %v521_v19 = vpop.f32.mrf.mxu0  ;;  %v2337_v7 = vld [vmem:[%s3135_s1 + $0x4c] sm:$0xf] }
 0x157   : > { %v598_v20 = vpop.f32.mrf.mxu3  ;;  %v1569_v21 = vpop.permute.xlu1 %1568 }
 0x158   : > { %v534_v22 = vpop.f32.mrf.mxu1  ;;  %v1574_v23 = vsel %vm1572_vm5, %v1567_v8, %v1569_v21  ;;  %v1725_v24 = vpop.permute.xlu2 %1724 }
 0x159   : > { %v1583_v26 = vsel %vm220_vm0, %v1574_v23, 0  ;;  %v1646_v27 = vpop.permute.xlu0 %1645 }
 0x15a   : > { %1608 = vmatpush.bf16.msrb.mxu3 %v1583_v26  ;;  %v1651_v29 = vsel %vm1649_vm6, %v1644_v60, %v1646_v27 }
 0x15b   : > { %v1660_v38 = vsel %vm220_vm0, %v1651_v29, 0 }
 0x15c   : > { %2330 = vmatmul.msk.bf16.vlgmr.msra.gmra.mxu3 %vm216_vm1, %v2996_v25 }
 0x15d   : > { %v547_v28 = vpop.f32.mrf.mxu2 }
 0x15f   : > { %v609_v31 = vpop.f32.mrf.mxu0  ;;  %v686_v32 = vpop.f32.mrf.mxu3 }
 0x160   : > { %v627_v34 = vadd.f32 %v609_v31, %v550_v13  ;;  %v622_v35 = vpop.f32.mrf.mxu1  ;;  %v1571_v36 = vpop.permute.xlu1 %1570 }
 0x161   : > { %v628_v37 = vadd.f32 %v622_v35, %v551_v18  ;;  %v1575_v39 = vsel %vm1572_vm5, %v1569_v21, %v1571_v36  ;;  %v1648_v40 = vpop.permute.xlu0 %1647  ;;  %v1796_v41 = vpop.permute.xlu2 %1795 }
 0x162   : > { %v704_v42 = vadd.f32 %v686_v32, %v627_v34  ;;  %2326 = vmatmul.msk.bf16.vlgmr.msra.gmra.mxu0 %vm216_vm1, %v2325_v33  ;;  %2328 = vmatmul.msk.bf16.vlgmr.msra.gmra.mxu2 %vm216_vm1, %v2325_v33  ;;  %v1586_v43 = vsel %vm220_vm0, %v1575_v39, 0  ;;  %v1652_v44 = vsel %vm1649_vm6, %v1646_v27, %v1648_v40 }
 0x163   : > { %2327 = vmatmul.msk.bf16.vlgmr.msra.gmra.mxu1 %vm216_vm1, %v2325_v33  ;;  %v1663_v45 = vsel %vm220_vm0, %v1652_v44, 0  ;;  %1621 = vmatpush.bf16.msra.mxu0 %v1586_v43 }
 0x164   : > { %1672 = vmatpush.bf16.msra.mxu1 %v1657_v0  ;;  %1685 = vmatpush.bf16.msra.mxu2 %v1660_v38 }
 0x165   : > { %v673_v46 = vpop.f32.mrf.mxu2  ;;  %1698 = vmatpush.bf16.msra.mxu3 %v1663_v45 }
 0x166   : > { %v703_v47 = vadd.f32 %v673_v46, %v626_v6 }
 0x167   : > { %v611_v48 = vpop.f32.mrf.mxu0  ;;  %v688_v49 = vpop.f32.mrf.mxu3 }
 0x168   : > { %v624_v50 = vpop.f32.mrf.mxu1  ;;  %v1723_v51 = vpop.permute.xlu1 %1722  ;;  %v2341_v49 = vld [vmem:[%s3135_s1 + $0x50] sm:$0xf] }
 0x169   : > { %v1719_v53 = vpop.permute.xlu0 %1718  ;;  %v1875_v54 = vpop.permute.xlu2 %1874  ;;  %v1729_v56 = vsel %vm1726_vm7, %v1723_v51, %v1725_v24 }
 0x16a   : > { %v1740_v61 = vsel %vm220_vm0, %v1729_v56, 0 }
 0x16c   : > { %2335 = vmatmul.msk.bf16.vlgmr.msrb.gmra.mxu3 %vm216_vm1, %v2333_v52 }
 0x16d   : > { %v675_v55 = vpop.f32.mrf.mxu2 }
 0x16f   : > { %v699_v57 = vpop.f32.mrf.mxu0  ;;  %v776_v58 = vpop.f32.mrf.mxu3 }
 0x170   : > { %v705_v59 = vadd.f32 %v699_v57, %v628_v37  ;;  %v750_v60 = vpop.f32.mrf.mxu1  ;;  %v1721_v62 = vpop.permute.xlu1 %1720 }
 0x171   : > { %v780_v63 = vadd.f32 %v750_v60, %v703_v47  ;;  %v1728_v1 = vsel %vm1726_vm7, %v1721_v62, %v1723_v51  ;;  %v1727_v2 = vsel %vm1726_vm7, %v1719_v53, %v1721_v62  ;;  %v1798_v3 = vpop.permute.xlu0 %1797  ;;  %v1877_v11 = vpop.permute.xlu2 %1876 }
 0x172   : > { %v782_v4 = vadd.f32 %v776_v58, %v705_v59  ;;  %2331 = vmatmul.msk.bf16.vlgmr.msrb.gmra.mxu0 %vm216_vm1, %v2996_v25  ;;  %2334 = vmatmul.msk.bf16.vlgmr.msrb.gmra.mxu2 %vm216_vm1, %v2333_v52  ;;  %v1737_v5 = vsel %vm220_vm0, %v1728_v1, 0  ;;  %v1734_v8 = vsel %vm220_vm0, %v1727_v2, 0  ;;  %v1804_v9 = vsel %vm1803_vm8, %v1796_v41, %v1798_v3  ;;  %v2345_v41 = vld [vmem:[%s3135_s1 + $0x54] sm:$0xf] }
 0x173   : > { %2332 = vmatmul.msk.bf16.vlgmr.msrb.gmra.mxu1 %vm216_vm1, %v2996_v25  ;;  %1775 = vmatpush.bf16.msrb.mxu2 %v1740_v61  ;;  %v1811_v10 = vsel %vm220_vm0, %v1804_v9, 0  ;;  %v1882_v15 = vsel %vm1880_vm9, %v1875_v54, %v1877_v11 }
 0x174   : > { %1762 = vmatpush.bf16.msrb.mxu1 %v1737_v5  ;;  %1749 = vmatpush.bf16.msrb.mxu0 %v1734_v8  ;;  %v1891_v19 = vsel %vm220_vm0, %v1882_v15, 0 }
 0x175   : > { %v763_v12 = vpop.f32.mrf.mxu2  ;;  %1826 = vmatpush.bf16.msrb.mxu3 %v1811_v10 }
 0x176   : > { %v781_v13 = vadd.f32 %v763_v12, %v704_v42 }
 0x177   : > { %v701_v6 = vpop.f32.mrf.mxu0  ;;  %v778_v14 = vpop.f32.mrf.mxu3 }
 0x178   : > { %v752_v16 = vpop.f32.mrf.mxu1  ;;  %v1873_v17 = vpop.permute.xlu1 %1872 }
 0x179   : > { %v1800_v18 = vpop.permute.xlu0 %1799  ;;  %v1881_v22 = vsel %vm1880_vm9, %v1873_v17, %v1875_v54  ;;  %v1879_v37 = vpop.permute.xlu2 %1878 }
 0x17a   : > { %v1805_v21 = vsel %vm1803_vm8, %v1798_v3, %v1800_v18  ;;  %v1888_v30 = vsel %vm220_vm0, %v1881_v22, 0  ;;  %v1883_v44 = vsel %vm1880_vm9, %v1877_v11, %v1879_v37  ;;  %v2349_v3 = vld [vmem:[%s3135_s1 + $0x58] sm:$0xf] }
 0x17b   : > { %v1814_v27 = vsel %vm220_vm0, %v1805_v21, 0 }
 0x17c   : > { %2340 = vmatmul.msk.bf16.vlgmr.msra.gmra.mxu3 %vm216_vm1, %v2337_v7 }
 0x17d   : > { %v765_v20 = vpop.f32.mrf.mxu2  ;;  %1916 = vmatpush.bf16.msra.mxu3 %v1891_v19 }
 0x17f   : > { %v827_v23 = vpop.f32.mrf.mxu0  ;;  %v904_v24 = vpop.f32.mrf.mxu3 }
 0x180   : > { %v857_v25 = vadd.f32 %v827_v23, %v780_v63  ;;  %v840_v26 = vpop.f32.mrf.mxu1  ;;  %v1802_v28 = vpop.permute.xlu1 %1801 }
 0x181   : > { %v858_v29 = vadd.f32 %v840_v26, %v781_v13  ;;  %v1806_v31 = vsel %vm1803_vm8, %v1800_v18, %v1802_v28  ;;  %v1952_v32 = vpop.permute.xlu0 %1951  ;;  %v2031_v58 = vpop.permute.xlu2 %2030 }
 0x182   : > { %v934_v33 = vadd.f32 %v904_v24, %v857_v25  ;;  %2336 = vmatmul.msk.bf16.vlgmr.msra.gmra.mxu0 %vm216_vm1, %v2333_v52  ;;  %2339 = vmatmul.msk.bf16.vlgmr.msra.gmra.mxu2 %vm216_vm1, %v2337_v7  ;;  %v1817_v34 = vsel %vm220_vm0, %v1806_v31, 0  ;;  %v1894_v52 = vsel %vm220_vm0, %v1883_v44, 0  ;;  %v2353_v25 = vld [vmem:[%s3135_s1 + $0x5c] sm:$0xf] }
 0x183   : > { %2338 = vmatmul.msk.bf16.vlgmr.msra.gmra.mxu1 %vm216_vm1, %v2337_v7  ;;  %1839 = vmatpush.bf16.msra.mxu0 %v1814_v27  ;;  %v2567_v27 = vmov 0  }
 0x184   : > { %1903 = vmatpush.bf16.msra.mxu2 %v1888_v30  ;;  %1852 = vmatpush.bf16.msra.mxu1 %v1817_v34  ;;  %v2092_v30 = vld [vmem:[%s3136_s2] sm:$0xff] }
 0x185   : > { %v853_v35 = vpop.f32.mrf.mxu2  ;;  %2450 = vset.pattern.permute.xlu0 %v2567_v27 }
 0x186   : > { %v859_v36 = vadd.f32 %v853_v35, %v782_v4  ;;  %2095 = vperm.xlu0 %2450, %v2092_v30  }
 0x187   : > { %v829_v38 = vpop.f32.mrf.mxu0  ;;  %v906_v39 = vpop.f32.mrf.mxu3 }
 0x188   : > { %v842_v0 = vpop.f32.mrf.mxu1  ;;  %v1954_v40 = vpop.permute.xlu1 %1953 }
 0x189   : > { %v1950_v42 = vpop.permute.xlu0 %1949  ;;  %v1959_v45 = vsel %vm1957_vm10, %v1952_v32, %v1954_v40  ;;  %v2029_v5 = vpop.permute.xlu2 %2028 }
 0x18a   : > { %v1958_v46 = vsel %vm1957_vm10, %v1950_v42, %v1952_v32  ;;  %v1968_v55 = vsel %vm220_vm0, %v1959_v45, 0  ;;  %v2036_v11 = vsel %vm2034_vm11, %v2029_v5, %v2031_v58  ;;  %v2357_v42 = vld [vmem:[%s3135_s1 + $0x60] sm:$0xf] }
 0x18b   : > { %v1965_v56 = vsel %vm220_vm0, %v1958_v46, 0  ;;  %v2045_v7 = vsel %vm220_vm0, %v2036_v11, 0 }
 0x18c   : > { %2346 = vmatmul.msk.bf16.vlgmr.msrb.gmra.mxu3 %vm216_vm1, %v2345_v41 }
 0x18d   : > { %v855_v43 = vpop.f32.mrf.mxu2 }
 0x18f   : > { %v917_v47 = vpop.f32.mrf.mxu0  ;;  %v994_v48 = vpop.f32.mrf.mxu3 }
 0x190   : > { %v935_v50 = vadd.f32 %v917_v47, %v858_v29  ;;  %v930_v51 = vpop.f32.mrf.mxu1  ;;  %v1956_v53 = vpop.permute.xlu1 %1955 }
 0x191   : > { %v936_v54 = vadd.f32 %v930_v51, %v859_v36  ;;  %v1960_v57 = vsel %vm1957_vm10, %v1954_v40, %v1956_v53  ;;  %v2033_v4 = vpop.permute.xlu0 %2032 }
 0x192   : > { %v1012_v59 = vadd.f32 %v994_v48, %v935_v50  ;;  %2342 = vmatmul.msk.bf16.vlgmr.msrb.gmra.mxu0 %vm216_vm1, %v2341_v49  ;;  %2344 = vmatmul.msk.bf16.vlgmr.msrb.gmra.mxu2 %vm216_vm1, %v2341_v49  ;;  %v1971_v60 = vsel %vm220_vm0, %v1960_v57, 0  ;;  %v2037_v10 = vsel %vm2034_vm11, %v2031_v58, %v2033_v4 }
 0x193   : > { %2343 = vmatmul.msk.bf16.vlgmr.msrb.gmra.mxu1 %vm216_vm1, %v2341_v49  ;;  %1929 = vmatpush.bf16.msrb.mxu0 %v1894_v52  ;;  %v2048_v16 = vsel %vm220_vm0, %v2037_v10, 0 }
 0x194   : > { %1980 = vmatpush.bf16.msrb.mxu1 %v1965_v56  ;;  %1993 = vmatpush.bf16.msrb.mxu2 %v1968_v55 }
 0x195   : > { %v981_v61 = vpop.f32.mrf.mxu2  ;;  %2006 = vmatpush.bf16.msrb.mxu3 %v1971_v60 }
 0x196   : > { %v1011_v62 = vadd.f32 %v981_v61, %v934_v33 }
 0x197   : > { %v919_v63 = vpop.f32.mrf.mxu0  ;;  %v996_v1 = vpop.f32.mrf.mxu3 }
 0x198   : > { %v932_v2 = vpop.f32.mrf.mxu1  ;;  %v2027_v8 = vpop.permute.xlu1 %2026 }
 0x199   : > { %v2035_v12 = vsel %vm2034_vm11, %v2027_v8, %v2029_v5 }
 0x19a   : > { %v2042_v18 = vsel %vm220_vm0, %v2035_v12, 0 }
 0x19c   : > { %2351 = vmatmul.msk.bf16.vlgmr.msra.gmra.mxu3 %vm216_vm1, %v2349_v3 }
 0x19d   : > { %v983_v9 = vpop.f32.mrf.mxu2 }
 0x19f   : > { %v1007_v13 = vpop.f32.mrf.mxu0  ;;  %v1084_v6 = vpop.f32.mrf.mxu3 }
 0x1a0   : > { %v1013_v14 = vadd.f32 %v1007_v13, %v936_v54  ;;  %v1058_v15 = vpop.f32.mrf.mxu1 }
 0x1a1   : > { %v1088_v17 = vadd.f32 %v1058_v15, %v1011_v62 }
 0x1a2   : > { %v1090_v19 = vadd.f32 %v1084_v6, %v1013_v14  ;;  %2347 = vmatmul.msk.bf16.vlgmr.msra.gmra.mxu0 %vm216_vm1, %v2345_v41  ;;  %2350 = vmatmul.msk.bf16.vlgmr.msra.gmra.mxu2 %vm216_vm1, %v2349_v3 }
 0x1a3   : > { %2348 = vmatmul.msk.bf16.vlgmr.msra.gmra.mxu1 %vm216_vm1, %v2345_v41  ;;  %2083 = vmatpush.bf16.msra.mxu2 %v2048_v16 }
 0x1a4   : > { %2070 = vmatpush.bf16.msra.mxu1 %v2045_v7  ;;  %2057 = vmatpush.bf16.msra.mxu0 %v2042_v18 }
 0x1a5   : > { %v1071_v20 = vpop.f32.mrf.mxu2 }
 0x1a6   : > { %v1089_v21 = vadd.f32 %v1071_v20, %v1012_v59 }
 0x1a7   : > { %v1009_v22 = vpop.f32.mrf.mxu0  ;;  %v1086_v23 = vpop.f32.mrf.mxu3 }
 0x1a8   : > { %v1060_v24 = vpop.f32.mrf.mxu1 }
 0x1ac   : > { %2356 = vmatmul.msk.bf16.vlgmr.msrb.gmra.mxu3 %vm216_vm1, %v2353_v25 }
 0x1ad   : > { %v1073_v26 = vpop.f32.mrf.mxu2 }
 0x1af   : > { %v1135_v28 = vpop.f32.mrf.mxu0  ;;  %v1212_v29 = vpop.f32.mrf.mxu3 }
 0x1b0   : > { %v1165_v31 = vadd.f32 %v1135_v28, %v1088_v17  ;;  %v1148_v32 = vpop.f32.mrf.mxu1 }
 0x1b1   : > { %v1166_v33 = vadd.f32 %v1148_v32, %v1089_v21 }
 0x1b2   : > { %v1242_v34 = vadd.f32 %v1212_v29, %v1165_v31  ;;  %2352 = vmatmul.msk.bf16.vlgmr.msrb.gmra.mxu0 %vm216_vm1, %v2349_v3  ;;  %2355 = vmatmul.msk.bf16.vlgmr.msrb.gmra.mxu2 %vm216_vm1, %v2353_v25 }
 0x1b3   : > { %2354 = vmatmul.msk.bf16.vlgmr.msrb.gmra.mxu1 %vm216_vm1, %v2353_v25 }
 0x1b5   : > { %v1161_v35 = vpop.f32.mrf.mxu2 }
 0x1b6   : > { %v1167_v36 = vadd.f32 %v1161_v35, %v1090_v19 }
 0x1b7   : > { %v1137_v37 = vpop.f32.mrf.mxu0  ;;  %v1214_v38 = vpop.f32.mrf.mxu3 }
 0x1b8   : > { %v1150_v39 = vpop.f32.mrf.mxu1 }
 0x1bd   : > { %v1163_v0 = vpop.f32.mrf.mxu2 }
 0x1bf   : > { %v1225_v40 = vpop.f32.mrf.mxu0  ;;  %v1302_v41 = vpop.f32.mrf.mxu3 }
 0x1c0   : > { %v1243_v43 = vadd.f32 %v1225_v40, %v1166_v33  ;;  %v1238_v44 = vpop.f32.mrf.mxu1 }
 0x1c1   : > { %v1244_v45 = vadd.f32 %v1238_v44, %v1167_v36 }
 0x1c2   : > { %v1320_v46 = vadd.f32 %v1302_v41, %v1243_v43  ;;  %2358 = vmatmul.msk.bf16.vlgmr.msra.gmra.mxu0 %vm216_vm1, %v2357_v42  ;;  %2360 = vmatmul.msk.bf16.vlgmr.msra.gmra.mxu2 %vm216_vm1, %v2357_v42 }
 0x1c3   : > { %2359 = vmatmul.msk.bf16.vlgmr.msra.gmra.mxu1 %vm216_vm1, %v2357_v42 }
 0x1c5   : > { %v1289_v47 = vpop.f32.mrf.mxu2 }
 0x1c6   : > { %v1319_v48 = vadd.f32 %v1289_v47, %v1242_v34 }
 0x1c7   : > { %v1227_v49 = vpop.f32.mrf.mxu0  ;;  %v1304_v50 = vpop.f32.mrf.mxu3 }
 0x1c8   : > { %v1240_v51 = vpop.f32.mrf.mxu1 }
 0x1cd   : > { %v1291_v52 = vpop.f32.mrf.mxu2 }
 0x1cf   : > { %v1315_v53 = vpop.f32.mrf.mxu0  ;;  %v1392_v54 = vpop.f32.mrf.mxu3 }
 0x1d0   : > { %v1321_v55 = vadd.f32 %v1315_v53, %v1244_v45  ;;  %v1366_v56 = vpop.f32.mrf.mxu1 }
 0x1d1   : > { %v1396_v57 = vadd.f32 %v1366_v56, %v1319_v48 }
 0x1d2   : > { %v1398_v58 = vadd.f32 %v1392_v54, %v1321_v55 }
 0x1d5   : > { %v1379_v59 = vpop.f32.mrf.mxu2 }
 0x1d6   : > { %v1397_v60 = vadd.f32 %v1379_v59, %v1320_v46 }
 0x1d7   : > { %v1317_v61 = vpop.f32.mrf.mxu0  ;;  %v1394_v62 = vpop.f32.mrf.mxu3 }
 0x1d8   : > { %v1368_v63 = vpop.f32.mrf.mxu1 }
 0x1dd   : > { %v1381_v1 = vpop.f32.mrf.mxu2 }
 0x1df   : > { %v1443_v2 = vpop.f32.mrf.mxu0  ;;  %v1520_v3 = vpop.f32.mrf.mxu3 }
 0x1e0   : > { %v1473_v4 = vadd.f32 %v1443_v2, %v1396_v57  ;;  %v1456_v5 = vpop.f32.mrf.mxu1 }
 0x1e1   : > { %v1474_v8 = vadd.f32 %v1456_v5, %v1397_v60 }
 0x1e2   : > { %v1550_v9 = vadd.f32 %v1520_v3, %v1473_v4 }
 0x1e5   : > { %v1469_v10 = vpop.f32.mrf.mxu2 }
 0x1e6   : > { %v1475_v11 = vadd.f32 %v1469_v10, %v1398_v58 }
 0x1e7   : > { %v1445_v12 = vpop.f32.mrf.mxu0  ;;  %v1522_v13 = vpop.f32.mrf.mxu3 }
 0x1e8   : > { %v1458_v6 = vpop.f32.mrf.mxu1 }
 0x1ed   : > { %v1471_v14 = vpop.f32.mrf.mxu2 }
 0x1ef   : > { %v1533_v15 = vpop.f32.mrf.mxu0  ;;  %v1610_v16 = vpop.f32.mrf.mxu3 }
 0x1f0   : > { %v1551_v17 = vadd.f32 %v1533_v15, %v1474_v8  ;;  %v1546_v7 = vpop.f32.mrf.mxu1 }
 0x1f1   : > { %v1552_v18 = vadd.f32 %v1546_v7, %v1475_v11 }
 0x1f2   : > { %v1628_v19 = vadd.f32 %v1610_v16, %v1551_v17 }
 0x1f5   : > { %v1597_v20 = vpop.f32.mrf.mxu2 }
 0x1f6   : > { %v1627_v51 = vadd.f32 %v1597_v20, %v1550_v9 }
 0x1f7   : > { %v1535_v21 = vpop.f32.mrf.mxu0  ;;  %v1612_v22 = vpop.f32.mrf.mxu3 }
 0x1f8   : > { %v1548_v23 = vpop.f32.mrf.mxu1  ;;  %v2096_v11 = vpop.permute.xlu0 %2095 }
 0x1fd   : > { %v1599_v24 = vpop.f32.mrf.mxu2 }
 0x1ff   : > { %v1623_v25 = vpop.f32.mrf.mxu0  ;;  %v1700_v26 = vpop.f32.mrf.mxu3 }
 0x200   : > { %v1674_v27 = vpop.f32.mrf.mxu1  ;;  %v1629_v55 = vadd.f32 %v1623_v25, %v1552_v18 }
 0x201   : > { %v1704_v52 = vadd.f32 %v1674_v27, %v1627_v51 }
 0x202   : > { %v1706_v62 = vadd.f32 %v1700_v26, %v1629_v55 }
 0x205   : > { %v1687_v28 = vpop.f32.mrf.mxu2 }
 0x206   : > { %v1705_v53 = vadd.f32 %v1687_v28, %v1628_v19 }
 0x207   : > { %v1625_v29 = vpop.f32.mrf.mxu0  ;;  %v1702_v30 = vpop.f32.mrf.mxu3 }
 0x208   : > { %v1676_v31 = vpop.f32.mrf.mxu1 }
 0x20d   : > { %v1689_v32 = vpop.f32.mrf.mxu2 }
 0x20f   : > { %v1751_v33 = vpop.f32.mrf.mxu0  ;;  %v1828_v34 = vpop.f32.mrf.mxu3 }
 0x210   : > { %v1764_v35 = vpop.f32.mrf.mxu1  ;;  %v1781_v56 = vadd.f32 %v1751_v33, %v1704_v52 }
 0x211   : > { %v1782_v57 = vadd.f32 %v1764_v35, %v1705_v53 }
 0x212   : > { %v1858_v63 = vadd.f32 %v1828_v34, %v1781_v56 }
 0x215   : > { %v1777_v36 = vpop.f32.mrf.mxu2 }
 0x216   : > { %v1783_v1 = vadd.f32 %v1777_v36, %v1706_v62 }
 0x217   : > { %v1753_v37 = vpop.f32.mrf.mxu0  ;;  %v1830_v38 = vpop.f32.mrf.mxu3 }
 0x218   : > { %v1766_v39 = vpop.f32.mrf.mxu1 }
 0x21d   : > { %v1779_v0 = vpop.f32.mrf.mxu2 }
 0x21f   : > { %v1841_v40 = vpop.f32.mrf.mxu0  ;;  %v1918_v41 = vpop.f32.mrf.mxu3 }
 0x220   : > { %v1854_v42 = vpop.f32.mrf.mxu1  ;;  %v1859_v61 = vadd.f32 %v1841_v40, %v1782_v57 }
 0x221   : > { %v1860_v5 = vadd.f32 %v1854_v42, %v1783_v1 }
 0x222   : > { %v1936_v3 = vadd.f32 %v1918_v41, %v1859_v61 }
 0x225   : > { %v1905_v43 = vpop.f32.mrf.mxu2 }
 0x226   : > { %v1935_v2 = vadd.f32 %v1905_v43, %v1858_v63 }
 0x227   : > { %v1843_v44 = vpop.f32.mrf.mxu0  ;;  %v1920_v45 = vpop.f32.mrf.mxu3 }
 0x228   : > { %v1856_v46 = vpop.f32.mrf.mxu1 }
 0x22d   : > { %v1907_v47 = vpop.f32.mrf.mxu2 }
 0x22f   : > { %v1931_v48 = vpop.f32.mrf.mxu0  ;;  %v2008_v49 = vpop.f32.mrf.mxu3 }
 0x230   : > { %v1982_v50 = vpop.f32.mrf.mxu1  ;;  %v1937_v12 = vadd.f32 %v1931_v48, %v1860_v5 }
 0x231   : > { %v2012_v8 = vadd.f32 %v1982_v50, %v1935_v2 }
 0x232   : > { %v2014_v17 = vadd.f32 %v2008_v49, %v1937_v12 }
 0x235   : > { %v1995_v54 = vpop.f32.mrf.mxu2 }
 0x236   : > { %v2013_v10 = vadd.f32 %v1995_v54, %v1936_v3 }
 0x237   : > { %v1933_v58 = vpop.f32.mrf.mxu0  ;;  %v2010_v59 = vpop.f32.mrf.mxu3 }
 0x238   : > { %v1984_v60 = vpop.f32.mrf.mxu1 }
 0x23d   : > { %v1997_v4 = vpop.f32.mrf.mxu2 }
 0x23f   : > { %v2059_v9 = vpop.f32.mrf.mxu0 }
 0x240   : > { %v2089_v13 = vadd.f32 %v2059_v9, %v2012_v8  ;;  %v2072_v6 = vpop.f32.mrf.mxu1 }
 0x241   : > { %v2090_v14 = vadd.f32 %v2072_v6, %v2013_v10 }
 0x242   : > { %v2098_v15 = vadd.f32 %v2096_v11, %v2089_v13 }
 0x243   : > { %v3085_v16 = vadd.f32 %v2096_v11, %v2090_v14 }
 0x244   : > { %v2361_v7 = vmul.f32 -1.442695, %v2098_v15 }
 0x245   : > { %v2362_v18 = vmul.f32 -1.442695, %v3085_v16  ;;  %v2085_v19 = vpop.f32.mrf.mxu2 }
 0x246   : > { %2451 = vpow2.f32 %v2361_v7  ;;  %v2091_v20 = vadd.f32 %v2085_v19, %v2014_v17 }
 0x247   : > { %2453 = vpow2.f32 %v2362_v18  ;;  %v2061_v21 = vpop.f32.mrf.mxu0 }
 0x248   : > { %v3088_v22 = vadd.f32 %v2096_v11, %v2091_v20  ;;  %v2074_v23 = vpop.f32.mrf.mxu1 }
 0x24a   : > { %v2363_v24 = vmul.f32 -1.442695, %v3088_v22 }
 0x24c   : > { %v2452_v25 = vpop.eup %2451  ;;  %2455 = vpow2.f32 %v2363_v24 }
 0x24d   : > { %v2454_v26 = vpop.eup %2453  ;;  %v2110_v27 = vadd.f32 1.0, %v2452_v25  ;;  %v2087_v28 = vpop.f32.mrf.mxu2 }
 0x24e   : > { %v2111_v29 = vadd.f32 1.0, %v2454_v26 }
 0x24f   : > { %2457 = vrcp.f32 %v2110_v27  ;;  %v2122_v37 = vand.u32 2147483647, %v2110_v27  ;;  %v2124_v38 = vand.u32 2147483648, %v2110_v27  ;;  %vm2118_vm12 = vweird.f32 %v2110_v27 }
 0x250   : > { %2459 = vrcp.f32 %v2111_v29  ;;  %v2137_v40 = vand.u32 2147483647, %v2111_v29  ;;  %v2139_v41 = vand.u32 2147483648, %v2111_v29  ;;  %vm2133_vm15 = vweird.f32 %v2111_v29 }
 0x251   : > { %vm2123_vm14 = vcmp.eq.f32.partialorder %v2122_v37, 8.507059e+37  ;;  %v2125_v46 = vor.u32 1.1754944e-38, %v2124_v38 }
 0x252   : > { %v2456_v30 = vpop.eup %2455  ;;  %vm2138_vm3 = vcmp.eq.f32.partialorder %v2137_v40, 8.507059e+37  ;;  %v2140_v49 = vor.u32 1.1754944e-38, %v2139_v41 }
 0x253   : > { %v2112_v31 = vadd.f32 1.0, %v2456_v30 }
 0x255   : > { %v2458_v32 = vpop.eup %2457  ;;  %2461 = vrcp.f32 %v2112_v31  ;;  %v2152_v53 = vand.u32 2147483647, %v2112_v31  ;;  %v2154_v54 = vand.u32 2147483648, %v2112_v31  ;;  %vm2148_vm5 = vweird.f32 %v2112_v31 }
 0x256   : > { %v2460_v33 = vpop.eup %2459  ;;  %v2114_v34 = vmul.f32 %v2458_v32, %v2110_v27  ;;  %vm2119_vm0 = vweird.f32 %v2458_v32 }
 0x257   : > { %v2129_v35 = vmul.f32 %v2460_v33, %v2111_v29  ;;  %vm2134_vm1 = vweird.f32 %v2460_v33  ;;  %vm2120_vm13 = vmor %vm2118_vm12, %vm2119_vm0  ;;  %v2155_v60 = vor.u32 1.1754944e-38, %v2154_v54  ;;  %vm2153_vm7 = vcmp.eq.f32.partialorder %v2152_v53, 8.507059e+37 }
 0x258   : > { %v2115_v36 = vsub.f32 1.0, %v2114_v34  ;;  %vm2135_vm2 = vmor %vm2133_vm15, %vm2134_vm1 }
 0x259   : > { %v2130_v39 = vsub.f32 1.0, %v2129_v35 }
 0x25a   : > { %v2116_v0 = vmul.f32 %v2458_v32, %v2115_v36 }
 0x25b   : > { %v2462_v42 = vpop.eup %2461  ;;  %v2131_v43 = vmul.f32 %v2460_v33, %v2130_v39 }
 0x25c   : > { %v2117_v44 = vadd.f32 %v2458_v32, %v2116_v0  ;;  %v2144_v45 = vmul.f32 %v2462_v42, %v2112_v31  ;;  %vm2149_vm4 = vweird.f32 %v2462_v42 }
 0x25d   : > { %v2132_v47 = vadd.f32 %v2460_v33, %v2131_v43  ;;  %vm2150_vm6 = vmor %vm2148_vm5, %vm2149_vm4 }
 0x25e   : > { %v2121_v48 = vsel %vm2120_vm13, %v2458_v32, %v2117_v44  ;;  %v2145_v50 = vsub.f32 1.0, %v2144_v45 }
 0x25f   : > { %v2126_v51 = vsel %vm2123_vm14, %v2125_v46, %v2121_v48  ;;  %v2136_v52 = vsel %vm2135_vm2, %v2460_v33, %v2132_v47 }
 0x260   : > { %v2141_v55 = vsel %vm2138_vm3, %v2140_v49, %v2136_v52  ;;  %v2158_v56 = vmul.f32 %v2126_v51, %v2098_v15  ;;  %v2146_v57 = vmul.f32 %v2462_v42, %v2145_v50 }
 0x261   : > { %v2159_v58 = vmul.f32 %v2141_v55, %v3085_v16 }
 0x262   : > { %2161 = vst [vmem:[%s177_s27] sm:$0xff] %v2158_v56  ;;  %v2147_v59 = vadd.f32 %v2462_v42, %v2146_v57 }
 0x263   : > { %2162 = vst [vmem:[%s177_s27 + $0x8] sm:$0xff] %v2159_v58 }
 0x264   : > { %v2151_v61 = vsel %vm2150_vm6, %v2462_v42, %v2147_v59 }
 0x265   : > { %v2156_v62 = vsel %vm2153_vm7, %v2155_v60, %v2151_v61 }
 0x266   : > { %v2160_v63 = vmul.f32 %v2156_v62, %v3088_v22 }
 0x268   : > { %2163 = vst [vmem:[%s177_s27 + $0x10] sm:$0xff] %v2160_v63 }
 0x269   : > { %2490 = shalt.err (!%p2487_p5)
}
 0x26a   : > { %2370 = dma.vmem_to_hbm [thread:$0]  (%p2628_p4), %s2181_s28, 384, %s2183_s29, %s2165_s30  }
 0x26b PF: > { %p2376_p6 = scmp.ge.s32.totalorder %s2541_s17, 2  ;;  %s2194_s11 = sand.u32 1, %s2521_s12  }
 0x26c   : > { %s2195_s18 = scalar_lea.sflag [#allocation3], %s2194_s11 }
 0x26d   : > { %p2373_p7 = pnand %p2376_p6, %p2635_p8 }
 0x26f   : > { %p2374_p9 = pneg %p2373_p7 }
 0x271   : > { %2516 = dma.done.wait (%p2374_p9), %s2195_s18, 384  }
 0x272   : > { %2518 = vsyncadd (%p2374_p9), %s2195_s18, 4294966912  ;;  %s16_s17 = sadd.s32 1, %s2541_s17   ;;  %s3140_s12 = smov %s2525_s13 }
 0x273   : > { %p13_p10 = scmp.ge.s32.totalorder %s16_s17, 4   ;;  %s3141_s13 = smov %s2529_s14 }
 0x274   : > { %s3142_s14 = smov %s2641_s25  ;;  %s3143_s15 = smov %s2537_s16 }
 0x275   : > { %s3144_s16 = smov %s3146_s20  ;;  %15 = sbr.rel (!%p13_p10) target bundleno = 4 (0x4), region = 92 }
 0x27a   :  { %2201 = vsyncpa [#allocation3], 1 }
 0x27b   :  { %2203 = vsyncpa [#allocation3 + $0x1], 1 }

</bundles_post_ra>
